<compile_context>
chip_gen: v5e
topology: v5e:2x2
jax: 0.10.0
libtpu: 0.0.40
codegen_flags: <defaults>
</compile_context>

<pallas_src>
import math
import functools

import jax
import jax.numpy as jnp
from jax import lax
from jax.experimental import pallas as pl
from jax.experimental.pallas import tpu as pltpu


def _layer_norm(z, gamma, beta, eps):
    mu = jnp.mean(z, axis=-1, keepdims=True)
    zc = z - mu
    var = jnp.mean(zc * zc, axis=-1, keepdims=True)
    return zc * lax.rsqrt(var + eps) * gamma + beta


def _gelu_exact(z):
    # F.gelu default = exact erf-based GELU
    return 0.5 * z * (1.0 + lax.erf(z * (1.0 / math.sqrt(2.0))))


def autocorr_block_kernel(x_ref, ma_ref, wqkv_ref, wo_ref, w1_ref, w2_ref,
                          g1_ref, b1_ref, g2_ref, b2_ref, o_ref,
                          *, n_heads, d_keys, eps, exact_recip):
    TB, L, D = x_ref.shape
    H, dk = n_heads, d_keys
    n_ffn_chunks = w1_ref.shape[0]
    cdt = wqkv_ref.dtype                      # matmul compute dtype (bf16 or f32)

    x3 = x_ref[...].astype(jnp.float32)       # (TB, L, D)
    x3c = x3.astype(cdt)
    ma = ma_ref[...]                          # (L, L) moving-average operator, cdt

    # ---- decomp1: trend = AvgPool25(x) as a per-sequence (L, L) matmul ----
    # (decomp2's trend cancels algebraically in the recombination -> not computed)
    trend1 = jnp.concatenate(
        [jnp.dot(ma, x3c[b], preferred_element_type=jnp.float32) for b in range(TB)],
        axis=0)                               # (TB*L, D) f32
    xf = x3.reshape(TB * L, D)
    s1 = xf - trend1                          # seasonal1 = attention-layer input
    s1c = s1.astype(cdt)

    # ---- AutoCorrelation: fori_loop over heads bounds per-head liveness ----
    head_iota = lax.broadcasted_iota(jnp.int32, (1, H, 1), 1)   # (1, H, 1)
    ones_row = jnp.ones((TB, 1, L), cdt)                        # MXU row-reducer

    def head_body(h, agg):
        w_h = wqkv_ref[h]                                        # (D, 2*dk+1), dyn lead idx
        qkv = jnp.dot(s1c, w_h, preferred_element_type=jnp.float32)   # (TB*L, 2dk+1)
        qh = qkv[:, :dk].reshape(TB, L, dk).astype(cdt)          # already 1/sqrt(dk)-scaled
        kh = qkv[:, dk:2 * dk].reshape(TB, L, dk).astype(cdt)
        vh = qkv[:, 2 * dk:2 * dk + 1].reshape(TB, L, 1)         # f32, d_values = 1

        # contraction on the last dim of BOTH operands -> no K transpose
        sc = jnp.einsum('bld,bsd->bls', qh, kh,
                        preferred_element_type=jnp.float32)       # (TB, L, S)
        sc = sc - jnp.max(sc, axis=-1, keepdims=True)
        e = jnp.exp(sc)
        denom = jnp.sum(e, axis=-1, keepdims=True)
        if exact_recip:
            corr = e / denom                                      # exact on f32 path
        else:
            corr = e * pl.reciprocal(denom, approx=True)          # EUP slot on bf16 path

        # simplified time_delay_agg: col[b, s] = sum_l v[b, l] * corr[b, l, s]
        # done as an MXU batched (1, L) x (L, S) matvec (no sublane reduction)
        col = jnp.einsum('bml,bls->bms', ones_row, (vh * corr).astype(cdt),
                         preferred_element_type=jnp.float32)      # (TB, 1, S)
        onehot = (head_iota == h).astype(jnp.float32)             # (1, H, 1)
        return agg + onehot * col                                 # scatter into head lane

    agg = lax.fori_loop(0, H, head_body,
                        jnp.zeros((TB, H, L), jnp.float32))       # (TB, H, S)
    agg = jnp.transpose(agg, (0, 2, 1)).reshape(TB * L, H)        # (TB*L, H)

    # W_o applied ONCE on the MXU
    new_x = jnp.dot(agg.astype(cdt), wo_ref[...],
                    preferred_element_type=jnp.float32)           # (TB*L, D)

    g1 = g1_ref[...]; b1 = b1_ref[...]
    g2 = g2_ref[...]; b2 = b2_ref[...]

    # ---- residual + norms + position-wise FFN (the two 1x1 convs), d_ff tiled ----
    x1 = _layer_norm(s1 + new_x, g1, b1, eps)     # x = norm1(x + dropout(new_x))
    x2 = _layer_norm(x1, g2, b2, eps)             # y = x = norm2(x)
    x2c = x2.astype(cdt)

    def ffn_body(c, acc):
        hc = jnp.dot(x2c, w1_ref[c], preferred_element_type=jnp.float32)   # (TB*L, C)
        hc = _gelu_exact(hc)
        return acc + jnp.dot(hc.astype(cdt), w2_ref[c],
                             preferred_element_type=jnp.float32)            # (TB*L, D)

    y = lax.fori_loop(0, n_ffn_chunks, ffn_body,
                      jnp.zeros((TB * L, D), jnp.float32))
    s2 = _layer_norm(x2 + y, g2, b2, eps)         # seasonal2 = norm2(x + y)

    # ---- recombination: trend1 + trend2 + (s2 - trend2) == trend1 + s2 ----
    o_ref[...] = (trend1 + s2).reshape(TB, L, D).astype(o_ref.dtype)


def prepare_autocorr_block_weights(params, *, seq_len, n_heads, d_keys, d_values,
                                   eps=1e-5, ma_kernel_size=25, ffn_chunk=None,
                                   compute_dtype=jnp.float32):
    """Constant weight transforms, done once and cached outside the hot path."""
    assert d_values == 1, "simplified time_delay_agg/view/W_o chain needs d_values == 1"
    cdt = compute_dtype
    H, dk = n_heads, d_keys

    wq = jnp.asarray(params["wq"], jnp.float32)          # (H*dk, D)
    wk = jnp.asarray(params["wk"], jnp.float32)          # (H*dk, D)
    wv = jnp.asarray(params["wv"], jnp.float32)          # (H, D)
    D = wq.shape[1]
    scale = 1.0 / math.sqrt(dk)                          # folded into Wq once

    wq_h = (wq * scale).reshape(H, dk, D).transpose(0, 2, 1)   # (H, D, dk)
    wk_h = wk.reshape(H, dk, D).transpose(0, 2, 1)             # (H, D, dk)
    wv_h = wv.reshape(H, 1, D).transpose(0, 2, 1)              # (H, D, 1)
    w_qkv = jnp.concatenate([wq_h, wk_h, wv_h], axis=-1).astype(cdt)   # (H, D, 2dk+1)

    wo_t = jnp.asarray(params["wo"], jnp.float32).T.astype(cdt)        # (H, D)
    w1_t = jnp.asarray(params["w1"], jnp.float32).T                    # (D, d_ff)
    w2_t = jnp.asarray(params["w2"], jnp.float32).T                    # (d_ff, D)
    d_ff = w1_t.shape[1]
    if ffn_chunk is None:
        ffn_chunk = min(d_ff, 512)
    if d_ff % ffn_chunk != 0:
        ffn_chunk = d_ff
    n_chunks = d_ff // ffn_chunk
    w1_c = w1_t.reshape(D, n_chunks, ffn_chunk).transpose(1, 0, 2).astype(cdt)  # (nc, D, C)
    w2_c = w2_t.reshape(n_chunks, ffn_chunk, D).astype(cdt)                      # (nc, C, D)

    # SeriesDecomp(25) == AvgPool1d(k=25, stride=1, pad=12, count_include_pad=True):
    # a linear map along L -> one constant (L, L) matrix.
    L = seq_len
    idx = jnp.arange(L)
    win = (jnp.abs(idx[:, None] - idx[None, :]) <= ma_kernel_size // 2)
    ma = (win.astype(jnp.float32) / float(ma_kernel_size)).astype(cdt)           # (L, L)

    return {
        "ma": ma, "w_qkv": w_qkv, "wo": wo_t, "w1": w1_c, "w2": w2_c,
        "g1": jnp.asarray(params["g1"], jnp.float32).reshape(1, D),
        "b1": jnp.asarray(params["b1"], jnp.float32).reshape(1, D),
        "g2": jnp.asarray(params["g2"], jnp.float32).reshape(1, D),
        "b2": jnp.asarray(params["b2"], jnp.float32).reshape(1, D),
        "n_heads": H, "d_keys": dk, "eps": eps,
        "exact_recip": compute_dtype == jnp.float32,
    }


def _pick_seq_block(B, L, target_rows=512):
    # target_rows ~ 512 fits v7x comfortably; raise toward 1024 on v5e/v6e.
    divisors = [d for d in range(1, B + 1) if B % d == 0]
    cand = [d for d in divisors if d * L <= target_rows and B // d >= 2] or divisors[:1]
    even = [d for d in cand if (B // d) % 2 == 0]       # v7x: 2 TCs share the grid
    return max(even) if even else max(cand)


def autocorrelation_block_pallas(x, prep, *, seq_block=None, target_rows=512,
                                 vmem_limit_bytes=48 * 1024 * 1024):
    B, L, D = x.shape
    TB = seq_block if seq_block is not None else _pick_seq_block(B, L, target_rows)
    assert B % TB == 0

    kernel = functools.partial(
        autocorr_block_kernel, n_heads=prep["n_heads"], d_keys=prep["d_keys"],
        eps=prep["eps"], exact_recip=prep["exact_recip"])

    def const_spec(a):
        zeros = (0,) * a.ndim
        # TODO(synk): pipeline_mode=pl.Buffered(1) here (constant index map).
        return pl.BlockSpec(a.shape, lambda b, _z=zeros: _z)

    ins = (x, prep["ma"], prep["w_qkv"], prep["wo"], prep["w1"], prep["w2"],
           prep["g1"], prep["b1"], prep["g2"], prep["b2"])

    return pl.pallas_call(
        kernel,
        out_shape=jax.ShapeDtypeStruct((B, L, D), x.dtype),
        grid=(B // TB,),
        in_specs=[pl.BlockSpec((TB, L, D), lambda b: (b, 0, 0))]
                 + [const_spec(a) for a in ins[1:]],
        out_specs=pl.BlockSpec((TB, L, D), lambda b: (b, 0, 0)),
        compiler_params=pltpu.CompilerParams(
            dimension_semantics=("parallel",),
            vmem_limit_bytes=vmem_limit_bytes),
    )(*ins)


# ----------------------------- pure-JAX reference -----------------------------

def _reference_layer(x, p, *, n_heads, d_keys, d_values, eps=1e-5):
    B, L, _ = x.shape
    H = n_heads
    q = (x @ p["wq"].T).reshape(B, L, H, d_keys).transpose(0, 2, 1, 3)
    k = (x @ p["wk"].T).reshape(B, L, H, d_keys).transpose(0, 2, 1, 3)
    v = (x @ p["wv"].T).reshape(B, L, H, d_values).transpose(0, 2, 1, 3)
    scores = jnp.einsum("bhld,bhsd->bhls", q, k) / math.sqrt(d_keys)
    corr = jax.nn.softmax(scores, axis=-1)                    # chosen `correlation`
    V = (v[..., None] * corr[..., None]).sum(axis=2)          # simplified time_delay_agg
    V = V.transpose(0, 2, 1, 3).reshape(B, L, -1)
    new_x = V @ p["wo"].T

    def ln(z, g, b):
        mu = z.mean(-1, keepdims=True)
        var = ((z - mu) ** 2).mean(-1, keepdims=True)
        return (z - mu) / jnp.sqrt(var + eps) * g + b

    x1 = ln(x + new_x, p["g1"], p["b1"])
    x2 = ln(x1, p["g2"], p["b2"])
    h = x2 @ p["w1"].T
    h = 0.5 * h * (1.0 + lax.erf(h / math.sqrt(2.0)))
    y = h @ p["w2"].T
    return ln(x2 + y, p["g2"], p["b2"])


def reference_block(x, p, *, n_heads, d_keys, d_values, eps=1e-5, ma_kernel=25):
    def moving_avg(z):
        P = ma_kernel // 2
        Lz = z.shape[1]
        zp = jnp.pad(z, ((0, 0), (P, P), (0, 0)))
        acc = jnp.zeros_like(z)
        for o in range(ma_kernel):
            acc = acc + zp[:, o:o + Lz, :]
        return acc / float(ma_kernel)          # count_include_pad=True -> always /k

    trend1 = moving_avg(x)
    seasonal1 = x - trend1
    seasonal2 = _reference_layer(seasonal1, p, n_heads=n_heads,
                                 d_keys=d_keys, d_values=d_values, eps=eps)
    trend2 = moving_avg(seasonal2)
    seasonal3 = seasonal2 - trend2
    return trend1 + trend2 + seasonal3


def make_params(key, d_model, n_heads, d_keys, d_values, d_ff):
    ks = jax.random.split(key, 6)

    def init(k, shape, fan_in):
        bound = 1.0 / math.sqrt(fan_in)
        return jax.random.uniform(k, shape, jnp.float32, -bound, bound)

    return {
        "wq": init(ks[0], (n_heads * d_keys, d_model), d_model),      # Linear (out, in)
        "wk": init(ks[1], (n_heads * d_keys, d_model), d_model),
        "wv": init(ks[2], (n_heads * d_values, d_model), d_model),
        "wo": init(ks[3], (d_model, n_heads * d_values), n_heads * d_values),
        "w1": init(ks[4], (d_ff, d_model), d_model),                  # conv1 (O, I, 1) squeezed
        "w2": init(ks[5], (d_model, d_ff), d_ff),                     # conv2 (O, I, 1) squeezed
        "g1": jnp.ones((d_model,), jnp.float32),                      # LayerNorm defaults
        "b1": jnp.zeros((d_model,), jnp.float32),
        "g2": jnp.ones((d_model,), jnp.float32),
        "b2": jnp.zeros((d_model,), jnp.float32),
    }


if __name__ == "__main__":
    B, L, d_model, n_heads = 4, 16, 32, 4
    d_keys = d_model // n_heads       # default d_keys
    d_values = 1                      # required for the simplified agg/view/W_o chain
    d_ff = 4 * d_model

    key = jax.random.PRNGKey(0)
    kx, kp = jax.random.split(key)
    x = jax.random.normal(kx, (B, L, d_model), jnp.float32)
    params = make_params(kp, d_model, n_heads, d_keys, d_values, d_ff)

    ref = reference_block(x, params, n_heads=n_heads, d_keys=d_keys, d_values=d_values)

    # f32 path: exact softmax reciprocal, tight correctness check.
    prep_f32 = prepare_autocorr_block_weights(
        params, seq_len=L, n_heads=n_heads, d_keys=d_keys, d_values=d_values,
        ffn_chunk=64, compute_dtype=jnp.float32)          # 2 FFN chunks exercise the tiled path
    out_f32 = autocorrelation_block_pallas(x, prep_f32, seq_block=2)
    out_f32 = jax.block_until_ready(out_f32)
    assert out_f32.shape == (B, L, d_model)
    err32 = float(jnp.max(jnp.abs(out_f32 - ref)))
    assert jnp.allclose(out_f32, ref, atol=3e-3, rtol=3e-3), f"f32 max abs err {err32}"

    # bf16 matmul-input path (MXU-native): f32 accumulation + f32 softmax/LN/GELU;
    # compared against the f32 reference with a loose sanity tolerance.
    prep_bf16 = prepare_autocorr_block_weights(
        params, seq_len=L, n_heads=n_heads, d_keys=d_keys, d_values=d_values,
        ffn_chunk=64, compute_dtype=jnp.bfloat16)
    out_bf16 = autocorrelation_block_pallas(x, prep_bf16, seq_block=2)
    out_bf16 = jax.block_until_ready(out_bf16)
    errbf = float(jnp.max(jnp.abs(out_bf16 - ref)))
    assert jnp.allclose(out_bf16, ref, atol=1e-1, rtol=1e-1), f"bf16 max abs err {errbf}"

    print("KERNEL_OK")
</pallas_src>

<mosaic_0001>
module attributes {stable_mosaic.version = 11 : i64} {
  func.func @autocorr_block_kernel(%arg0: i32, %arg1: memref<2x16x32xf32, #tpu.memory_space<vmem>>, %arg2: memref<16x16xf32, #tpu.memory_space<vmem>>, %arg3: memref<4x32x17xf32, #tpu.memory_space<vmem>>, %arg4: memref<4x32xf32, #tpu.memory_space<vmem>>, %arg5: memref<2x32x64xf32, #tpu.memory_space<vmem>>, %arg6: memref<2x64x32xf32, #tpu.memory_space<vmem>>, %arg7: memref<1x32xf32, #tpu.memory_space<vmem>>, %arg8: memref<1x32xf32, #tpu.memory_space<vmem>>, %arg9: memref<1x32xf32, #tpu.memory_space<vmem>>, %arg10: memref<1x32xf32, #tpu.memory_space<vmem>>, %arg11: memref<2x16x32xf32, #tpu.memory_space<vmem>>) attributes {dimension_semantics = [#tpu.dimension_semantics<parallel>], iteration_bounds = array<i64: 2>, scalar_prefetch = 0 : i64, scratch_operands = 0 : i64, tpu.core_type = #tpu.core_type<tc>, window_params = [{transform_indices = @transform_0, window_bounds = array<i64: 2, 16, 32>}, {pipeline_mode = #tpu.pipeline_mode<synchronous>, transform_indices = @transform_1, window_bounds = array<i64: 16, 16>}, {pipeline_mode = #tpu.pipeline_mode<synchronous>, transform_indices = @transform_2, window_bounds = array<i64: 4, 32, 17>}, {pipeline_mode = #tpu.pipeline_mode<synchronous>, transform_indices = @transform_3, window_bounds = array<i64: 4, 32>}, {pipeline_mode = #tpu.pipeline_mode<synchronous>, transform_indices = @transform_4, window_bounds = array<i64: 2, 32, 64>}, {pipeline_mode = #tpu.pipeline_mode<synchronous>, transform_indices = @transform_5, window_bounds = array<i64: 2, 64, 32>}, {pipeline_mode = #tpu.pipeline_mode<synchronous>, transform_indices = @transform_6, window_bounds = array<i64: 1, 32>}, {pipeline_mode = #tpu.pipeline_mode<synchronous>, transform_indices = @transform_7, window_bounds = array<i64: 1, 32>}, {pipeline_mode = #tpu.pipeline_mode<synchronous>, transform_indices = @transform_8, window_bounds = array<i64: 1, 32>}, {pipeline_mode = #tpu.pipeline_mode<synchronous>, transform_indices = @transform_9, window_bounds = array<i64: 1, 32>}, {transform_indices = @transform_10, window_bounds = array<i64: 2, 16, 32>}]} {
    %c0 = arith.constant 0 : index
    %c0_0 = arith.constant 0 : index
    %c0_1 = arith.constant 0 : index
    %0 = vector.load %arg1[%c0, %c0_0, %c0_1] : memref<2x16x32xf32, #tpu.memory_space<vmem>>, vector<2x16x32xf32>
    %c0_2 = arith.constant 0 : index
    %c0_3 = arith.constant 0 : index
    %1 = vector.load %arg2[%c0_2, %c0_3] : memref<16x16xf32, #tpu.memory_space<vmem>>, vector<16x16xf32>
    %2 = vector.extract_strided_slice %0 {offsets = [0, 0, 0], sizes = [1, 16, 32], strides = [1, 1, 1]} : vector<2x16x32xf32> to vector<1x16x32xf32>
    %3 = vector.shape_cast %2 : vector<1x16x32xf32> to vector<16x32xf32>
    %cst = arith.constant dense<0.000000e+00> : vector<16x32xf32>
    %4 = tpu.matmul %1, %3, %cst {dimension_numbers = #tpu.dot_dimension_numbers<[1], [0], [0], [1], [0, 0, 1, 1], [], []>} : vector<16x16xf32>, vector<16x32xf32>, vector<16x32xf32> -> vector<16x32xf32>
    %5 = vector.extract_strided_slice %0 {offsets = [1, 0, 0], sizes = [1, 16, 32], strides = [1, 1, 1]} : vector<2x16x32xf32> to vector<1x16x32xf32>
    %6 = vector.shape_cast %5 : vector<1x16x32xf32> to vector<16x32xf32>
    %cst_4 = arith.constant dense<0.000000e+00> : vector<16x32xf32>
    %7 = tpu.matmul %1, %6, %cst_4 {dimension_numbers = #tpu.dot_dimension_numbers<[1], [0], [0], [1], [0, 0, 1, 1], [], []>} : vector<16x16xf32>, vector<16x32xf32>, vector<16x32xf32> -> vector<16x32xf32>
    %8 = tpu.concatenate %4, %7 in 0 : vector<16x32xf32>, vector<16x32xf32> -> vector<32x32xf32>
    %9 = vector.shape_cast %0 : vector<2x16x32xf32> to vector<32x32xf32>
    %10 = arith.subf %9, %8 : vector<32x32xf32>
    %11 = tpu.iota {dimensions = array<i32: 1>} : vector<1x4x1xi32>
    %cst_5 = arith.constant 1.000000e+00 : f32
    %12 = vector.broadcast %cst_5 : f32 to vector<2x1x16xf32>
    %cst_6 = arith.constant 0.000000e+00 : f32
    %13 = vector.broadcast %cst_6 : f32 to vector<2x4x16xf32>
    %c0_i32 = arith.constant 0 : i32
    %c4_i32 = arith.constant 4 : i32
    %14 = arith.addi %c0_i32, %c4_i32 : i32
    %c1_i32 = arith.constant 1 : i32
    %15 = scf.for %arg12 = %c0_i32 to %14 step %c1_i32 iter_args(%arg13 = %13) -> (vector<2x4x16xf32>)  : i32 {
      %92 = arith.index_cast %arg12 : i32 to index
      %c0_41 = arith.constant 0 : index
      %c0_42 = arith.constant 0 : index
      %93 = vector.load %arg3[%92, %c0_41, %c0_42] : memref<4x32x17xf32, #tpu.memory_space<vmem>>, vector<1x32x17xf32>
      %94 = vector.shape_cast %93 : vector<1x32x17xf32> to vector<32x17xf32>
      %cst_43 = arith.constant dense<0.000000e+00> : vector<32x17xf32>
      %95 = tpu.matmul %10, %94, %cst_43 {dimension_numbers = #tpu.dot_dimension_numbers<[1], [0], [0], [1], [0, 0, 1, 1], [], []>} : vector<32x32xf32>, vector<32x17xf32>, vector<32x17xf32> -> vector<32x17xf32>
      %96 = vector.extract_strided_slice %95 {offsets = [0, 0], sizes = [32, 8], strides = [1, 1]} : vector<32x17xf32> to vector<32x8xf32>
      %97 = vector.shape_cast %96 : vector<32x8xf32> to vector<2x16x8xf32>
      %98 = vector.extract_strided_slice %95 {offsets = [0, 8], sizes = [32, 8], strides = [1, 1]} : vector<32x17xf32> to vector<32x8xf32>
      %99 = vector.shape_cast %98 : vector<32x8xf32> to vector<2x16x8xf32>
      %100 = vector.extract_strided_slice %95 {offsets = [0, 16], sizes = [32, 1], strides = [1, 1]} : vector<32x17xf32> to vector<32x1xf32>
      %101 = vector.shape_cast %100 : vector<32x1xf32> to vector<2x16x1xf32>
      "tpu.trace_start"() <{level = 10 : i32, message = "bld,bsd->bls"}> : () -> ()
      %cst_44 = arith.constant dense<0.000000e+00> : vector<2x16x16xf32>
      %102 = tpu.matmul %97, %99, %cst_44 {dimension_numbers = #tpu.dot_dimension_numbers<[2], [2], [1], [1], [0, 0, 0, 1, 1, 1], [0], [0]>} : vector<2x16x8xf32>, vector<2x16x8xf32>, vector<2x16x16xf32> -> vector<2x16x16xf32>
      "tpu.trace_stop"() : () -> ()
      %cst_45 = arith.constant dense<0xFF800000> : vector<2x16xf32>
      %103 = vector.multi_reduction <maximumf>, %102, %cst_45 [2] : vector<2x16x16xf32> to vector<2x16xf32>
      %104 = vector.shape_cast %103 : vector<2x16xf32> to vector<2x16x1xf32>
      %105 = vector.broadcast %104 : vector<2x16x1xf32> to vector<2x16x16xf32>
      %106 = arith.subf %102, %105 : vector<2x16x16xf32>
      %107 = math.exp %106 : vector<2x16x16xf32>
      %cst_46 = arith.constant dense<0.000000e+00> : vector<2x16xf32>
      %108 = vector.multi_reduction <add>, %107, %cst_46 [2] : vector<2x16x16xf32> to vector<2x16xf32>
      %109 = vector.shape_cast %108 : vector<2x16xf32> to vector<2x16x1xf32>
      %110 = vector.broadcast %109 : vector<2x16x1xf32> to vector<2x16x16xf32>
      %111 = arith.divf %107, %110 : vector<2x16x16xf32>
      %112 = vector.broadcast %101 : vector<2x16x1xf32> to vector<2x16x16xf32>
      %113 = arith.mulf %112, %111 : vector<2x16x16xf32>
      "tpu.trace_start"() <{level = 10 : i32, message = "bml,bls->bms"}> : () -> ()
      %cst_47 = arith.constant dense<0.000000e+00> : vector<2x1x16xf32>
      %114 = tpu.matmul %12, %113, %cst_47 {dimension_numbers = #tpu.dot_dimension_numbers<[2], [1], [1], [2], [0, 0, 0, 1, 1, 2], [0], [0]>} : vector<2x1x16xf32>, vector<2x16x16xf32>, vector<2x1x16xf32> -> vector<2x1x16xf32>
      "tpu.trace_stop"() : () -> ()
      %115 = vector.broadcast %arg12 : i32 to vector<1x4x1xi32>
      %116 = arith.cmpi eq, %11, %115 : vector<1x4x1xi32>
      %117 = arith.extui %116 : vector<1x4x1xi1> to vector<1x4x1xi32>
      %118 = arith.sitofp %117 : vector<1x4x1xi32> to vector<1x4x1xf32>
      %119 = vector.broadcast %118 : vector<1x4x1xf32> to vector<2x4x16xf32>
      %120 = vector.broadcast %114 : vector<2x1x16xf32> to vector<2x4x16xf32>
      %121 = arith.mulf %119, %120 : vector<2x4x16xf32>
      %122 = arith.addf %arg13, %121 : vector<2x4x16xf32>
      scf.yield %122 : vector<2x4x16xf32>
    }
    %c4_i32_7 = arith.constant 4 : i32
    %16 = tpu.transpose %15, [0, 2, 1] : vector<2x4x16xf32> -> vector<2x16x4xf32>
    %17 = vector.shape_cast %16 : vector<2x16x4xf32> to vector<32x4xf32>
    %c0_8 = arith.constant 0 : index
    %c0_9 = arith.constant 0 : index
    %18 = vector.load %arg4[%c0_8, %c0_9] : memref<4x32xf32, #tpu.memory_space<vmem>>, vector<4x32xf32>
    %cst_10 = arith.constant dense<0.000000e+00> : vector<32x32xf32>
    %19 = tpu.matmul %17, %18, %cst_10 {dimension_numbers = #tpu.dot_dimension_numbers<[1], [0], [0], [1], [0, 0, 1, 1], [], []>} : vector<32x4xf32>, vector<4x32xf32>, vector<32x32xf32> -> vector<32x32xf32>
    %c0_11 = arith.constant 0 : index
    %c0_12 = arith.constant 0 : index
    %20 = vector.load %arg7[%c0_11, %c0_12] : memref<1x32xf32, #tpu.memory_space<vmem>>, vector<1x32xf32>
    %c0_13 = arith.constant 0 : index
    %c0_14 = arith.constant 0 : index
    %21 = vector.load %arg8[%c0_13, %c0_14] : memref<1x32xf32, #tpu.memory_space<vmem>>, vector<1x32xf32>
    %c0_15 = arith.constant 0 : index
    %c0_16 = arith.constant 0 : index
    %22 = vector.load %arg9[%c0_15, %c0_16] : memref<1x32xf32, #tpu.memory_space<vmem>>, vector<1x32xf32>
    %c0_17 = arith.constant 0 : index
    %c0_18 = arith.constant 0 : index
    %23 = vector.load %arg10[%c0_17, %c0_18] : memref<1x32xf32, #tpu.memory_space<vmem>>, vector<1x32xf32>
    %24 = arith.addf %10, %19 : vector<32x32xf32>
    %cst_19 = arith.constant dense<0.000000e+00> : vector<32xf32>
    %25 = vector.multi_reduction <add>, %24, %cst_19 [1] : vector<32x32xf32> to vector<32xf32>
    %26 = vector.shape_cast %25 : vector<32xf32> to vector<32x1xf32>
    %cst_20 = arith.constant 3.200000e+01 : f32
    %27 = vector.broadcast %cst_20 : f32 to vector<32x1xf32>
    %28 = arith.divf %26, %27 : vector<32x1xf32>
    %29 = vector.broadcast %28 : vector<32x1xf32> to vector<32x32xf32>
    %30 = arith.subf %24, %29 : vector<32x32xf32>
    %31 = arith.mulf %30, %30 : vector<32x32xf32>
    %cst_21 = arith.constant dense<0.000000e+00> : vector<32xf32>
    %32 = vector.multi_reduction <add>, %31, %cst_21 [1] : vector<32x32xf32> to vector<32xf32>
    %33 = vector.shape_cast %32 : vector<32xf32> to vector<32x1xf32>
    %cst_22 = arith.constant 3.200000e+01 : f32
    %34 = vector.broadcast %cst_22 : f32 to vector<32x1xf32>
    %35 = arith.divf %33, %34 : vector<32x1xf32>
    %cst_23 = arith.constant 9.99999974E-6 : f32
    %36 = vector.broadcast %cst_23 : f32 to vector<32x1xf32>
    %37 = arith.addf %35, %36 : vector<32x1xf32>
    %38 = math.rsqrt %37 : vector<32x1xf32>
    %39 = vector.broadcast %38 : vector<32x1xf32> to vector<32x32xf32>
    %40 = arith.mulf %30, %39 : vector<32x32xf32>
    %41 = vector.broadcast %20 : vector<1x32xf32> to vector<32x32xf32>
    %42 = arith.mulf %40, %41 : vector<32x32xf32>
    %43 = vector.broadcast %21 : vector<1x32xf32> to vector<32x32xf32>
    %44 = arith.addf %42, %43 : vector<32x32xf32>
    %cst_24 = arith.constant dense<0.000000e+00> : vector<32xf32>
    %45 = vector.multi_reduction <add>, %44, %cst_24 [1] : vector<32x32xf32> to vector<32xf32>
    %46 = vector.shape_cast %45 : vector<32xf32> to vector<32x1xf32>
    %cst_25 = arith.constant 3.200000e+01 : f32
    %47 = vector.broadcast %cst_25 : f32 to vector<32x1xf32>
    %48 = arith.divf %46, %47 : vector<32x1xf32>
    %49 = vector.broadcast %48 : vector<32x1xf32> to vector<32x32xf32>
    %50 = arith.subf %44, %49 : vector<32x32xf32>
    %51 = arith.mulf %50, %50 : vector<32x32xf32>
    %cst_26 = arith.constant dense<0.000000e+00> : vector<32xf32>
    %52 = vector.multi_reduction <add>, %51, %cst_26 [1] : vector<32x32xf32> to vector<32xf32>
    %53 = vector.shape_cast %52 : vector<32xf32> to vector<32x1xf32>
    %cst_27 = arith.constant 3.200000e+01 : f32
    %54 = vector.broadcast %cst_27 : f32 to vector<32x1xf32>
    %55 = arith.divf %53, %54 : vector<32x1xf32>
    %cst_28 = arith.constant 9.99999974E-6 : f32
    %56 = vector.broadcast %cst_28 : f32 to vector<32x1xf32>
    %57 = arith.addf %55, %56 : vector<32x1xf32>
    %58 = math.rsqrt %57 : vector<32x1xf32>
    %59 = vector.broadcast %58 : vector<32x1xf32> to vector<32x32xf32>
    %60 = arith.mulf %50, %59 : vector<32x32xf32>
    %61 = vector.broadcast %22 : vector<1x32xf32> to vector<32x32xf32>
    %62 = arith.mulf %60, %61 : vector<32x32xf32>
    %63 = vector.broadcast %23 : vector<1x32xf32> to vector<32x32xf32>
    %64 = arith.addf %62, %63 : vector<32x32xf32>
    %cst_29 = arith.constant 0.000000e+00 : f32
    %65 = vector.broadcast %cst_29 : f32 to vector<32x32xf32>
    %c0_i32_30 = arith.constant 0 : i32
    %c2_i32 = arith.constant 2 : i32
    %66 = arith.addi %c0_i32_30, %c2_i32 : i32
    %c1_i32_31 = arith.constant 1 : i32
    %67 = scf.for %arg12 = %c0_i32_30 to %66 step %c1_i32_31 iter_args(%arg13 = %65) -> (vector<32x32xf32>)  : i32 {
      %92 = arith.index_cast %arg12 : i32 to index
      %c0_41 = arith.constant 0 : index
      %c0_42 = arith.constant 0 : index
      %93 = vector.load %arg5[%92, %c0_41, %c0_42] : memref<2x32x64xf32, #tpu.memory_space<vmem>>, vector<1x32x64xf32>
      %94 = vector.shape_cast %93 : vector<1x32x64xf32> to vector<32x64xf32>
      %cst_43 = arith.constant dense<0.000000e+00> : vector<32x64xf32>
      %95 = tpu.matmul %64, %94, %cst_43 {dimension_numbers = #tpu.dot_dimension_numbers<[1], [0], [0], [1], [0, 0, 1, 1], [], []>} : vector<32x32xf32>, vector<32x64xf32>, vector<32x64xf32> -> vector<32x64xf32>
      %cst_44 = arith.constant 5.000000e-01 : f32
      %96 = vector.broadcast %cst_44 : f32 to vector<32x64xf32>
      %97 = arith.mulf %96, %95 : vector<32x64xf32>
      %cst_45 = arith.constant 0.707106769 : f32
      %98 = vector.broadcast %cst_45 : f32 to vector<32x64xf32>
      %99 = arith.mulf %95, %98 : vector<32x64xf32>
      %100 = math.erf %99 : vector<32x64xf32>
      %cst_46 = arith.constant 1.000000e+00 : f32
      %101 = vector.broadcast %cst_46 : f32 to vector<32x64xf32>
      %102 = arith.addf %101, %100 : vector<32x64xf32>
      %103 = arith.mulf %97, %102 : vector<32x64xf32>
      %104 = arith.index_cast %arg12 : i32 to index
      %c0_47 = arith.constant 0 : index
      %c0_48 = arith.constant 0 : index
      %105 = vector.load %arg6[%104, %c0_47, %c0_48] : memref<2x64x32xf32, #tpu.memory_space<vmem>>, vector<1x64x32xf32>
      %106 = vector.shape_cast %105 : vector<1x64x32xf32> to vector<64x32xf32>
      %cst_49 = arith.constant dense<0.000000e+00> : vector<32x32xf32>
      %107 = tpu.matmul %103, %106, %cst_49 {dimension_numbers = #tpu.dot_dimension_numbers<[1], [0], [0], [1], [0, 0, 1, 1], [], []>} : vector<32x64xf32>, vector<64x32xf32>, vector<32x32xf32> -> vector<32x32xf32>
      %108 = arith.addf %arg13, %107 : vector<32x32xf32>
      scf.yield %108 : vector<32x32xf32>
    }
    %c2_i32_32 = arith.constant 2 : i32
    %68 = arith.addf %64, %67 : vector<32x32xf32>
    %cst_33 = arith.constant dense<0.000000e+00> : vector<32xf32>
    %69 = vector.multi_reduction <add>, %68, %cst_33 [1] : vector<32x32xf32> to vector<32xf32>
    %70 = vector.shape_cast %69 : vector<32xf32> to vector<32x1xf32>
    %cst_34 = arith.constant 3.200000e+01 : f32
    %71 = vector.broadcast %cst_34 : f32 to vector<32x1xf32>
    %72 = arith.divf %70, %71 : vector<32x1xf32>
    %73 = vector.broadcast %72 : vector<32x1xf32> to vector<32x32xf32>
    %74 = arith.subf %68, %73 : vector<32x32xf32>
    %75 = arith.mulf %74, %74 : vector<32x32xf32>
    %cst_35 = arith.constant dense<0.000000e+00> : vector<32xf32>
    %76 = vector.multi_reduction <add>, %75, %cst_35 [1] : vector<32x32xf32> to vector<32xf32>
    %77 = vector.shape_cast %76 : vector<32xf32> to vector<32x1xf32>
    %cst_36 = arith.constant 3.200000e+01 : f32
    %78 = vector.broadcast %cst_36 : f32 to vector<32x1xf32>
    %79 = arith.divf %77, %78 : vector<32x1xf32>
    %cst_37 = arith.constant 9.99999974E-6 : f32
    %80 = vector.broadcast %cst_37 : f32 to vector<32x1xf32>
    %81 = arith.addf %79, %80 : vector<32x1xf32>
    %82 = math.rsqrt %81 : vector<32x1xf32>
    %83 = vector.broadcast %82 : vector<32x1xf32> to vector<32x32xf32>
    %84 = arith.mulf %74, %83 : vector<32x32xf32>
    %85 = vector.broadcast %22 : vector<1x32xf32> to vector<32x32xf32>
    %86 = arith.mulf %84, %85 : vector<32x32xf32>
    %87 = vector.broadcast %23 : vector<1x32xf32> to vector<32x32xf32>
    %88 = arith.addf %86, %87 : vector<32x32xf32>
    %89 = arith.addf %8, %88 : vector<32x32xf32>
    %90 = vector.shape_cast %89 : vector<32x32xf32> to vector<2x16x32xf32>
    %c0_38 = arith.constant 0 : index
    %c0_39 = arith.constant 0 : index
    %c0_40 = arith.constant 0 : index
    %91 = vector.load %arg11[%c0_38, %c0_39, %c0_40] : memref<2x16x32xf32, #tpu.memory_space<vmem>>, vector<2x16x32xf32>
    tpu.vector_store %arg11[%c0_38, %c0_39, %c0_40], %90 {strides = array<i32>} : memref<2x16x32xf32, #tpu.memory_space<vmem>>, vector<2x16x32xf32>,
    return
  }
  func.func @transform_0(%arg0: i32) -> (i32, i32, i32) {
    %c0_i32 = arith.constant 0 : i32
    %c0_i32_0 = arith.constant 0 : i32
    %c0_i32_1 = arith.constant 0 : i32
    return %arg0, %c0_i32, %c0_i32_0 : i32, i32, i32
  }
  func.func @transform_1(%arg0: i32) -> (i32, i32) {
    %c0_i32 = arith.constant 0 : i32
    %c0_i32_0 = arith.constant 0 : i32
    %c0_i32_1 = arith.constant 0 : i32
    return %c0_i32, %c0_i32_0 : i32, i32
  }
  func.func @transform_2(%arg0: i32) -> (i32, i32, i32) {
    %c0_i32 = arith.constant 0 : i32
    %c0_i32_0 = arith.constant 0 : i32
    %c0_i32_1 = arith.constant 0 : i32
    %c0_i32_2 = arith.constant 0 : i32
    return %c0_i32, %c0_i32_0, %c0_i32_1 : i32, i32, i32
  }
  func.func @transform_3(%arg0: i32) -> (i32, i32) {
    %c0_i32 = arith.constant 0 : i32
    %c0_i32_0 = arith.constant 0 : i32
    %c0_i32_1 = arith.constant 0 : i32
    return %c0_i32, %c0_i32_0 : i32, i32
  }
  func.func @transform_4(%arg0: i32) -> (i32, i32, i32) {
    %c0_i32 = arith.constant 0 : i32
    %c0_i32_0 = arith.constant 0 : i32
    %c0_i32_1 = arith.constant 0 : i32
    %c0_i32_2 = arith.constant 0 : i32
    return %c0_i32, %c0_i32_0, %c0_i32_1 : i32, i32, i32
  }
  func.func @transform_5(%arg0: i32) -> (i32, i32, i32) {
    %c0_i32 = arith.constant 0 : i32
    %c0_i32_0 = arith.constant 0 : i32
    %c0_i32_1 = arith.constant 0 : i32
    %c0_i32_2 = arith.constant 0 : i32
    return %c0_i32, %c0_i32_0, %c0_i32_1 : i32, i32, i32
  }
  func.func @transform_6(%arg0: i32) -> (i32, i32) {
    %c0_i32 = arith.constant 0 : i32
    %c0_i32_0 = arith.constant 0 : i32
    %c0_i32_1 = arith.constant 0 : i32
    return %c0_i32, %c0_i32_0 : i32, i32
  }
  func.func @transform_7(%arg0: i32) -> (i32, i32) {
    %c0_i32 = arith.constant 0 : i32
    %c0_i32_0 = arith.constant 0 : i32
    %c0_i32_1 = arith.constant 0 : i32
    return %c0_i32, %c0_i32_0 : i32, i32
  }
  func.func @transform_8(%arg0: i32) -> (i32, i32) {
    %c0_i32 = arith.constant 0 : i32
    %c0_i32_0 = arith.constant 0 : i32
    %c0_i32_1 = arith.constant 0 : i32
    return %c0_i32, %c0_i32_0 : i32, i32
  }
  func.func @transform_9(%arg0: i32) -> (i32, i32) {
    %c0_i32 = arith.constant 0 : i32
    %c0_i32_0 = arith.constant 0 : i32
    %c0_i32_1 = arith.constant 0 : i32
    return %c0_i32, %c0_i32_0 : i32, i32
  }
  func.func @transform_10(%arg0: i32) -> (i32, i32, i32) {
    %c0_i32 = arith.constant 0 : i32
    %c0_i32_0 = arith.constant 0 : i32
    %c0_i32_1 = arith.constant 0 : i32
    return %arg0, %c0_i32, %c0_i32_0 : i32, i32, i32
  }
}

</mosaic_0001>

<bundles_post_ra>
// kernel: tpu_custom_call.1
= control target key start
LH: loop header
LB: loop body
LE: loop exit
PB: predicated region body
PF: predicated region fallthrough
CT: control target
= control target key end

     0   :  { %15 = vsyncpa [#allocation3], 0  ;;  %s2512_s0 = inlined_call_operand.vmem [shape: f32[4,16,32], index: 0, kind: input, shape index: {}]   ;;  %s2513_s1 = inlined_call_operand.vmem [shape: f32[16,16], index: 1, kind: input, shape index: {}]   ;;  %s2514_s2 = inlined_call_operand.vmem [shape: f32[4,32,17], index: 2, kind: input, shape index: {}]   ;;  %s2515_s3 = inlined_call_operand.vmem [shape: f32[4,32], index: 3, kind: input, shape index: {}]   ;;  %s2516_s4 = inlined_call_operand.vmem [shape: f32[2,32,64], index: 4, kind: input, shape index: {}]   ;;  %s2517_s5 = inlined_call_operand.vmem [shape: f32[2,64,32], index: 5, kind: input, shape index: {}]   ;;  %s2518_s6 = inlined_call_operand.vmem [shape: f32[1,32], index: 6, kind: input, shape index: {}]   ;;  %s2519_s7 = inlined_call_operand.vmem [shape: f32[1,32], index: 7, kind: input, shape index: {}]   ;;  %s2520_s8 = inlined_call_operand.vmem [shape: f32[1,32], index: 8, kind: input, shape index: {}]   ;;  %s2521_s9 = inlined_call_operand.vmem [shape: f32[1,32], index: 9, kind: input, shape index: {}]   ;;  %s2522_s10 = inlined_call_operand.hbm [shape: f32[4,16,32], index: 10, kind: output, shape index: {}]  }
   0x1   :  { %17 = vsyncpa [#allocation3 + $0x1], 0  ;;  %s2007_s13 = smov 0   ;;  %s2009_s14 = smov 0  }
   0x2   :  { %s2011_s15 = smov 0   ;;  %s2013_s16 = smov 0  }
   0x3 LB: > { %s2028_s17 = sadd.s32 4294967295, %s1911_s16   ;;  %s1570_s18 = sadd.s32 4294967294, %s1911_s16   ;;  %s1911_s16 = sphi %s2013_s16, %s2536_s16   ;;  %s1907_s15 = sphi %s2011_s15, %s2535_s15   ;;  %s1903_s14 = sphi %s2009_s14, %s2534_s14   ;;  %s1899_s13 = sphi %s2007_s13, %s2533_s13  }
   0x4   : > { %s2032_s19 = sadd.s32 1, %s1911_s16   ;;  %s245_s20 = sadd.s32 1, %s1907_s15 }
   0x5   : > { %s242_s21 = ssub.s32 %s1911_s16, %s2032_s19  ;;  %p255_p0 = scmp.ne.s32.totalorder %s1907_s15, %s1903_s14 }
   0x6   : > { %p243_p1 = scmp.eq.s32.totalorder %s242_s21, 0  ;;  %p256_p2 = scmp.eq.s32.totalorder %s2028_s17, 1 }
   0x7   : > { %p261_p3 = scmp.ne.s32.totalorder %s1903_s14, %s1899_s13  ;;  %p262_p4 = scmp.eq.s32.totalorder %s1570_s18, 1 }
   0x8   : > { %s2043_s22 = scalar_select %p243_p1, %s1907_s15, %s245_s20  }
   0x9   : > { %p2045_p5 = por %p256_p2, %p255_p0  ;;  %p2049_p6 = por %p262_p4, %p261_p3 }
   0xa   : > { %p1573_p7 = scmp.ge.s32.totalorder %s1911_s16, 1  ;;  %p317_p8 = scmp.lt.s32.totalorder %s1911_s16, 3 }
   0xc   : > { %p318_p9 = pnand %p1573_p7, %p317_p8 }
   0xd   : > { %s1575_s25 = sshll.u32 (!%p318_p9), %s2028_s17, 1  ;;  %s353_s26 = sand.u32 (!%p318_p9), 1, %s1903_s14  }
   0xe   : > { %321 = sbr.rel (%p318_p9) target bundleno = 2464 (0x9a0), region = 60  ;;  %p357_p10 = scmp.lt.s32.totalorder (!%p318_p9), %s1575_s25, 3 }
   0xf   : > { %s2059_s27 = sshll.u32 (!%p318_p9), %s353_s26, 5 }
  0x13   : > { %s2538_s25 = smov (!%p357_p10, %s1575_s25), 3  ;;  %v369_v4 = vld [vmem:[%s2513_s1 + $0x8] sm:$0xff]  ;;  %vm370_vm0 = vcmask 130048   ;;  %v368_v5 = vld [vmem:[%s2513_s1] sm:$0xff]  ;;  %v427_v6 = vlaneseq  ;;  %v2099_v16 = vmov 0.0   ;;  %v2101_v17 = vmov 0.0  }
  0x14   : > { %s1623_s28 = sshll.u32 %s2538_s25, 4  ;;  %s2097_s25 = scalar_lea.vmem [#allocation2], %s2059_s27 }
  0x15   : > { %s361_s11 = scalar_lea.vmem %s2512_s0, %s1623_s28  ;;  %v2074_v7 = vshrl.u32 %v427_v6, 7  ;;  %s2103_s28 = smov 0  }
  0x16   : > { %v365_v0 = vld [vmem:[%s361_s11 + $0x8] sm:$0xff]  ;;  %v367_v1 = vld [vmem:[%s361_s11 + $0x18] sm:$0xff]  ;;  %v364_v2 = vld [vmem:[%s361_s11] sm:$0xff] }
  0x17   : > { %1626 = vmatpush.msra.mxu2 %v365_v0  ;;  %1628 = vmatpush.msra.mxu3 %v367_v1  ;;  %v366_v3 = vld [vmem:[%s361_s11 + $0x10] sm:$0xff] }
  0x18   : > { %391 = vmatpush.msra.mxu0 %v365_v0  ;;  %414 = vmatpush.msra.mxu1 %v367_v1 }
  0x19   : > { %1627 = vmatpush.msra.mxu2 %v364_v2  ;;  %1629 = vmatpush.msra.mxu3 %v366_v3 }
  0x1a   : > { %1579 = vmatmul.msk.f32.vlgmr.msra.gmra.mxu2 %vm370_vm0, %v369_v4  ;;  %1581 = vmatmul.msk.f32.vlgmr.msra.gmra.mxu3 %vm370_vm0, %v369_v4 }
  0x1b   : > { %392 = vmatpush.msra.mxu0 %v364_v2  ;;  %415 = vmatpush.msra.mxu1 %v366_v3 }
  0x1c   : > { %1578 = vmatmul.msk.f32.vlgmr.msra.gmra.mxu0 %vm370_vm0, %v368_v5  ;;  %1580 = vmatmul.msk.f32.vlgmr.msra.gmra.mxu1 %vm370_vm0, %v368_v5 }
  0x99   : > { %v2076_v8 = vpop.f32.mrf.mxu0  ;;  %v2078_v9 = vpop.f32.mrf.mxu1 }
  0x9a   : > { %v2081_v10 = vsub.f32 %v364_v2, %v2076_v8  ;;  %v2084_v11 = vsub.f32 %v366_v3, %v2078_v9 }
  0x9d   : > { %v2086_v12 = vpop.f32.mrf.mxu2  ;;  %v2088_v13 = vpop.f32.mrf.mxu3 }
  0x9e   : > { %v2091_v14 = vsub.f32 %v365_v0, %v2086_v12  ;;  %v2094_v15 = vsub.f32 %v367_v1, %v2088_v13 }
  0x9f LB: >> { %s1582_s27 = sshll.u32 %s1923_s28, 5  ;;  %vm443_vm1 = vcmask 261120   ;;  %s1945_s12 = smov 120   ;;  %vm491_vm2 = vcmask 64512   ;;  %v1946_v30 = vmov 16   ;;  %s1923_s28 = sphi %s2103_s28, %s434_s28   ;;  %v1919_v17 = vphi %v2101_v17, %v2526_v17   ;;  %v1915_v16 = vphi %v2099_v16, %v2525_v16  }
  0xa0   : >> { %s438_s11 = scalar_lea.vmem %s2514_s2, %s1582_s27  ;;  %1760 = vset.pattern.permute.xlu2 %v1946_v30  ;;  %1762 = vset.pattern.permute.xlu1 %v1946_v30 }
  0xa1   : >> { %v442_v18 = vld [vmem:[%s438_s11 + $0x18] sm:$0xff]  ;;  %v441_v19 = vld [vmem:[%s438_s11 + $0x10] sm:$0xff]  ;;  %v440_v20 = vld [vmem:[%s438_s11 + $0x8] sm:$0xff]  ;;  %1761 = vset.pattern.permute.xlu0 %v1946_v30 }
  0xa2   : >> { %468 = vmatpush.msra.mxu0 %v442_v18  ;;  %1630 = vmatpush.msra.mxu3 %v442_v18  ;;  %v439_v21 = vld [vmem:[%s438_s11] sm:$0xff] }
  0xa4   : >> { %469 = vmatpush.msra.mxu0 %v441_v19  ;;  %1631 = vmatpush.msra.mxu3 %v441_v19 }
  0xa6   : >> { %470 = vmatpush.msra.mxu0 %v440_v20  ;;  %1632 = vmatpush.msra.mxu3 %v440_v20 }
  0xa8   : >> { %471 = vmatpush.msra.mxu0 %v439_v21  ;;  %1633 = vmatpush.msra.mxu3 %v439_v21 }
  0xa9   : >> { %1583 = vmatmul.msk.f32.vlgmr.msra.gmra.mxu0 %vm443_vm1, %v2081_v10  ;;  %1586 = vmatmul.msk.f32.vlgmr.msra.gmra.mxu3 %vm443_vm1, %v2094_v15 }
  0xb1   : >> { %1584 = vmatmul.msk.f32.gmra.mxu0 %vm443_vm1, %v2091_v14 }
  0xb9   : >> { %1585 = vmatmul.msk.f32.gmra.mxu0 %vm443_vm1, %v2084_v11 }
 0x126   : >> { %v473_v22 = vpop.f32.mrf.mxu0 }
 0x127   : >> { %487 = vrot.lane.b32.xlu1 %v473_v22, %s1945_s12 }
 0x12c   : >> { %v482_v24 = vpop.f32.mrf.mxu3 }
 0x12e   : >> { %v476_v23 = vpop.f32.mrf.mxu0 }
 0x12f   : >> { %489 = vrot.lane.b32.xlu0 %v476_v23, %s1945_s12 }
 0x136   : >> { %v479_v25 = vpop.f32.mrf.mxu0 }
 0x137   : >> { %527 = vrot.lane.b32.xlu0 %v482_v24, %s1945_s12  ;;  %525 = vrot.lane.b32.xlu1 %v479_v25, %s1945_s12 }
 0x199   : >> { %v488_v27 = vpop.permute.xlu1 %487 }
 0x1a1   : >> { %v490_v26 = vpop.permute.xlu0 %489 }
 0x1a2   : >> { %1587 = vmatpush.xpose.msk.msra.mxu1 %vm491_vm2, %v490_v26 }
 0x1a6   : >> { %1588 = vmatpush.xpose.msk.msra.mxu1 %vm491_vm2, %v488_v27 }
 0x1a9   : >> { %1589 = vmatmul.msk.f32.vlgmr.msra.gmra.mxu1 %vm491_vm2, %v473_v22  ;;  %v528_v28 = vpop.permute.xlu0 %527  ;;  %v526_v29 = vpop.permute.xlu1 %525 }
 0x1aa   : >> { %1591 = vmatpush.xpose.msk.msra.mxu2 %vm491_vm2, %v528_v28 }
 0x1ae   : >> { %1592 = vmatpush.xpose.msk.msra.mxu2 %vm491_vm2, %v526_v29 }
 0x1b1   : >> { %1590 = vmatmul.msk.f32.gmra.mxu1 %vm491_vm2, %v476_v23  ;;  %1593 = vmatmul.msk.f32.vlgmr.msra.gmra.mxu2 %vm491_vm2, %v479_v25 }
 0x1b9   : >> { %1594 = vmatmul.msk.f32.gmra.mxu2 %vm491_vm2, %v482_v24 }
 0x226   : >> { %v517_v31 = vpop.f32.mrf.mxu1 }
 0x227   : >> { %v560_v32 = vsel %vm370_vm0, %v517_v31, -inf }
 0x228   : >> { %561 = vmax.xlane.f32.xlu2 %v560_v32 }
 0x22e   : >> { %v520_v33 = vpop.f32.mrf.mxu1 }
 0x22f   : >> { %v563_v34 = vsel %vm370_vm0, %v520_v33, -inf }
 0x230   : >> { %564 = vmax.xlane.f32.xlu2 %v563_v34 }
 0x234   : >> { %v554_v35 = vpop.f32.mrf.mxu2 }
 0x235   : >> { %v566_v36 = vsel %vm370_vm0, %v554_v35, -inf }
 0x236   : >> { %567 = vmax.xlane.f32.xlu1 %v566_v36 }
 0x23c   : >> { %v557_v37 = vpop.f32.mrf.mxu2 }
 0x23d   : >> { %v569_v38 = vsel %vm370_vm0, %v557_v37, -inf }
 0x23e   : >> { %570 = vmax.xlane.f32.xlu0 %v569_v38 }
 0x248   : >> { %661 = vperm.xlu2 %1760, %v476_v23  }
 0x24f   : >> { %669 = vperm.xlu1 %1762, %v482_v24  }
 0x252   : >> { %657 = vperm.xlu0 %1761, %v473_v22  }
 0x29b   : >> { %v562_v39 = vpop.xlane.xlu2 %561 }
 0x29c   : >> { %v572_v40 = vsub.f32 %v517_v31, %v562_v39 }
 0x29e   : >> { %v576_v41 = vmul.f32 1.442695, %v572_v40 }
 0x2a0   : >> { %1763 = vpow2.f32 %v576_v41 }
 0x2a3   : >> { %v565_v42 = vpop.xlane.xlu2 %564 }
 0x2a4   : >> { %v573_v43 = vsub.f32 %v520_v33, %v565_v42 }
 0x2a6   : >> { %v2130_v44 = vpop.eup %1763  ;;  %v578_v45 = vmul.f32 1.442695, %v573_v43 }
 0x2a7   : >> { %v584_v46 = vsel %vm370_vm0, %v2130_v44, 0.0 }
 0x2a8   : >> { %1765 = vpow2.f32 %v578_v45  ;;  %585 = vadd.xlane.f32.xlu2 %v584_v46 }
 0x2a9   : >> { %v568_v47 = vpop.xlane.xlu1 %567 }
 0x2aa   : >> { %v574_v48 = vsub.f32 %v554_v35, %v568_v47  ;;  %v1947_v47 = vmov 1.0  }
 0x2ab   : >> { %v662_v59 = vpop.permute.xlu2 %661 }
 0x2ac   : >> { %v580_v49 = vmul.f32 1.442695, %v574_v48 }
 0x2ae   : >> { %v1766_v50 = vpop.eup %1765  ;;  %1767 = vpow2.f32 %v580_v49 }
 0x2af   : >> { %v587_v51 = vsel %vm370_vm0, %v1766_v50, 0.0 }
 0x2b0   : >> { %588 = vadd.xlane.f32.xlu2 %v587_v51 }
 0x2b1   : >> { %v571_v52 = vpop.xlane.xlu0 %570 }
 0x2b2   : >> { %v575_v53 = vsub.f32 %v557_v37, %v571_v52 }
 0x2b4   : >> { %v2135_v54 = vpop.eup %1767  ;;  %v582_v55 = vmul.f32 1.442695, %v575_v53 }
 0x2b5   : >> { %v590_v56 = vsel %vm370_vm0, %v2135_v54, 0.0 }
 0x2b6   : >> { %1769 = vpow2.f32 %v582_v55 }
 0x2b8   : >> { %591 = vadd.xlane.f32.xlu2 %v590_v56 }
 0x2bc   : >> { %v2139_v57 = vpop.eup %1769 }
 0x2bd   : >> { %v593_v58 = vsel %vm370_vm0, %v2139_v57, 0.0 }
 0x2c0   : >> { %594 = vadd.xlane.f32.xlu2 %v593_v58 }
 0x2c4   : >> { %v658_v38 = vpop.permute.xlu0 %657 }
 0x2d8   : >> { %665 = vperm.xlu2 %1760, %v479_v25  }
 0x31b   : >> { %v586_v60 = vpop.xlane.xlu2 %585 }
 0x31c   : >> { %1771 = vrcp.f32 %v586_v60  ;;  %v607_v6 = vand.u32 2147483648, %v586_v60  ;;  %vm601_vm4 = vweird.f32 %v586_v60  ;;  %v605_v19 = vand.u32 2147483647, %v586_v60 }
 0x31e   : >> { %v608_v25 = vor.u32 1.1754944e-38, %v607_v6  ;;  %vm606_vm9 = vcmp.eq.f32.partialorder %v605_v19, 8.507059e+37 }
 0x322   : >> { %v1772_v61 = vpop.eup %1771 }
 0x323   : >> { %v597_v62 = vmul.f32 %v1772_v61, %v586_v60  ;;  %v589_v63 = vpop.xlane.xlu2 %588  ;;  %vm602_vm3 = vweird.f32 %v1772_v61 }
 0x324   : >> { %1773 = vrcp.f32 %v589_v63  ;;  %v622_v21 = vand.u32 2147483648, %v589_v63  ;;  %vm603_vm6 = vmor %vm601_vm4, %vm602_vm3  ;;  %v620_v22 = vand.u32 2147483647, %v589_v63  ;;  %vm616_vm7 = vweird.f32 %v589_v63 }
 0x325   : >> { %v598_v0 = vsub.f32 1.0, %v597_v62 }
 0x326   : >> { %v623_v30 = vor.u32 1.1754944e-38, %v622_v21  ;;  %vm621_vm10 = vcmp.eq.f32.partialorder %v620_v22, 8.507059e+37 }
 0x327   : >> { %v599_v1 = vmul.f32 %v1772_v61, %v598_v0 }
 0x329   : >> { %v600_v5 = vadd.f32 %v1772_v61, %v599_v1  ;;  %v719_v1 = vstv %s1923_s28  ;;  %s434_s28 = sadd.s32 1, %s1923_s28  }
 0x32a   : >> { %v1774_v2 = vpop.eup %1773  ;;  %p431_p11 = scmp.ge.s32.totalorder %s434_s28, 4  }
 0x32b   : >> { %v612_v3 = vmul.f32 %v1774_v2, %v589_v63  ;;  %v592_v4 = vpop.xlane.xlu2 %591  ;;  %vm617_vm5 = vweird.f32 %v1774_v2  ;;  %v604_v23 = vsel %vm603_vm6, %v1772_v61, %v600_v5  ;;  %v670_v61 = vpop.permute.xlu1 %669  ;;  %vm807_vm6 = vcmask (%p431_p11), 1043456   ;;  %s2276_s20 = smov (%p431_p11), 0  }
 0x32c   : >> { %1775 = vrcp.f32 %v592_v4  ;;  %vm618_vm8 = vmor %vm616_vm7, %vm617_vm5  ;;  %v609_v31 = vsel %vm606_vm9, %v608_v25, %v604_v23  ;;  %v637_v43 = vand.u32 2147483648, %v592_v4  ;;  %vm631_vm12 = vweird.f32 %v592_v4 }
 0x32d   : >> { %v613_v18 = vsub.f32 1.0, %v612_v3  ;;  %v610_v35 = vmul.f32 %v2130_v44, %v609_v31  ;;  %v635_v46 = vand.u32 2147483647, %v592_v4  ;;  %vm720_vm5 = vcmp.eq.s32.totalorder %v2074_v7, %v719_v1 }
 0x32e   : >> { %v638_v51 = vor.u32 1.1754944e-38, %v637_v43  ;;  %v1948_v3 = vmov 0.0   ;;  %vm794_vm7 = vcmask (%p431_p11), 31744  }
 0x32f   : >> { %v614_v20 = vmul.f32 %v1774_v2, %v613_v18  ;;  %v672_v40 = vmul.f32 %v658_v38, %v610_v35  ;;  %vm636_vm2 = vcmp.eq.f32.partialorder %v635_v46, 8.507059e+37 }
 0x331   : >> { %v615_v24 = vadd.f32 %v1774_v2, %v614_v20 }
 0x332   : >> { %v1776_v26 = vpop.eup %1775 }
 0x333   : >> { %v627_v27 = vmul.f32 %v1776_v26, %v592_v4  ;;  %v595_v28 = vpop.xlane.xlu2 %594  ;;  %v619_v29 = vsel %vm618_vm8, %v1774_v2, %v615_v24  ;;  %vm632_vm11 = vweird.f32 %v1776_v26  ;;  %v1597_v4 = vsel %vm720_vm5, 1.0, %v1948_v3 }
 0x334   : >> { %1777 = vrcp.f32 %v595_v28  ;;  %v624_v33 = vsel %vm621_vm10, %v623_v30, %v619_v29  ;;  %v652_v48 = vand.u32 2147483648, %v595_v28  ;;  %vm633_vm13 = vmor %vm631_vm12, %vm632_vm11  ;;  %v650_v49 = vand.u32 2147483647, %v595_v28 }
 0x335   : >> { %v628_v32 = vsub.f32 1.0, %v627_v27  ;;  %v625_v34 = vmul.f32 %v1766_v50, %v624_v33  ;;  %vm646_vm15 = vweird.f32 %v595_v28 }
 0x336   : >> { %v653_v53 = vor.u32 1.1754944e-38, %v652_v48  ;;  %vm651_vm4 = vcmp.eq.f32.partialorder %v650_v49, 8.507059e+37 }
 0x337   : >> { %v629_v36 = vmul.f32 %v1776_v26, %v628_v32  ;;  %v673_v37 = vmul.f32 %v662_v59, %v625_v34  ;;  %v1949_v34 = vmov (%p431_p11), 32.0  }
 0x338   : > { %1783 = vrcp.f32 (%p431_p11), %v1949_v34 }
 0x339   : >> { %693 = vmatpush.msrb.mxu3 %v673_v37  ;;  %v630_v42 = vadd.f32 %v1776_v26, %v629_v36 }
 0x33a   : >> { %v1778_v39 = vpop.eup %1777 }
 0x33b   : >> { %v642_v41 = vmul.f32 %v1778_v39, %v595_v28  ;;  %694 = vmatpush.msrb.mxu3 %v672_v40  ;;  %vm647_vm14 = vweird.f32 %v1778_v39  ;;  %v634_v50 = vsel %vm633_vm13, %v1776_v26, %v630_v42  ;;  %v666_v63 = vpop.permute.xlu2 %665 }
 0x33c   : >> { %1595 = vmatmul.msk.f32.vlgmr.msrb.gmra.mxu3 %vm370_vm0, %v1947_v47  ;;  %vm648_vm3 = vmor %vm646_vm15, %vm647_vm14  ;;  %v639_v55 = vsel %vm636_vm2, %v638_v51, %v634_v50 }
 0x33d   : >> { %v643_v45 = vsub.f32 1.0, %v642_v41  ;;  %v640_v59 = vmul.f32 %v2135_v54, %v639_v55 }
 0x33e   : > { %v1784_v35 = vpop.eup (%p431_p11), %1783 }
 0x33f   : >> { %v644_v44 = vmul.f32 %v1778_v39, %v643_v45  ;;  %v674_v0 = vmul.f32 %v666_v63, %v640_v59  ;;  %v862_v36 = vmul.f32 (%p431_p11), 32.0, %v1784_v35 }
 0x341   : >> { %v645_v52 = vadd.f32 %v1778_v39, %v644_v44 }
 0x343   : >> { %v649_v56 = vsel %vm648_vm3, %v1778_v39, %v645_v52 }
 0x344   : >> { %v654_v58 = vsel %vm651_vm4, %v653_v53, %v649_v56 }
 0x345   : >> { %v655_v60 = vmul.f32 %v2139_v57, %v654_v58 }
 0x347   : >> { %v675_v62 = vmul.f32 %v670_v61, %v655_v60 }
 0x349   : >> { %713 = vmatpush.msra.mxu3 %v675_v62 }
 0x34b   : >> { %714 = vmatpush.msra.mxu3 %v674_v0 }
 0x34c   : >> { %1596 = vmatmul.msk.f32.vlgmr.msra.gmra.mxu3 %vm370_vm0, %v1947_v47  ;;  %vm866_vm0 = vweird.f32 (%p431_p11), %v1784_v35 }
 0x3bf   : >> { %v696_v2 = vpop.f32.mrf.mxu3 }
 0x3c0   : >> { %v723_v5 = vperm.slane %v696_v2, 0 }
 0x3c2   : >> { %v725_v6 = vmul.f32 %v1597_v4, %v723_v5 }
 0x3c4   : >> { %v727_v54 = vadd.f32 %v1919_v17, %v725_v6  }
 0x3c6   : >> { %v2526_v17 = vmov %v727_v54 }
 0x3c7   : > { %v793_v17 = vld [vmem:[%s2515_s3] sm:$0xf] (%p431_p11) }
 0x3c8   : > { %1635 = vmatpush.msk.msra.mxu2 (%p431_p11), %vm807_vm6, %v793_v17  ;;  %1636 = vmatpush.msk.msra.mxu3 (%p431_p11), %vm807_vm6, %v793_v17 }
 0x3c9   : > { %1598 = vmatpush.msk.msra.mxu0 (%p431_p11), %vm807_vm6, %v793_v17  ;;  %1634 = vmatpush.msk.msra.mxu1 (%p431_p11), %vm807_vm6, %v793_v17 }
 0x3cf   : >> { %v716_v18 = vpop.f32.mrf.mxu3 }
 0x3d0   : >> { %v724_v57 = vperm.slane %v716_v18, 0 }
 0x3d2   : >> { %v726_v19 = vmul.f32 %v1597_v4, %v724_v57  ;;  %433 = sbr.rel (!%p431_p11) target bundleno = 159 (0x9f), region = 112 }
 0x3d4   : >> { %v728_v20 = vadd.f32 %v1915_v16, %v726_v19  }
 0x3d6   : >> { %v2525_v16 = vmov %v728_v20  ;;  %761 = vxpose.xlu0.b32.start.end [1/1] (short) (narrow) (%p431_p11), %v728_v20, 16 }
 0x3e6   : > { %729 = vxpose.xlu0.b32.start.end [1/1] (short) (narrow) %v727_v54, 16 }
 0x47a   : > { %v777_v21 = vpop.trf.xlu0 }
 0x47b   : > { %1601 = vmatmul.msk.f32.vlgmr.msra.gmra.mxu2 %vm794_vm7, %v777_v21 }
 0x482   : > { %v778_v22 = vpop.trf.xlu0 }
 0x483   : > { %1602 = vmatmul.msk.f32.vlgmr.msra.gmra.mxu3 %vm794_vm7, %v778_v22 }
 0x48a   : > { %v745_v23 = vpop.trf.xlu0 }
 0x48b   : > { %1599 = vmatmul.msk.f32.vlgmr.msra.gmra.mxu0 %vm794_vm7, %v745_v23 }
 0x492   : > { %v746_v24 = vpop.trf.xlu0 }
 0x493   : > { %1600 = vmatmul.msk.f32.vlgmr.msra.gmra.mxu1 %vm794_vm7, %v746_v24 }
 0x4fe   : > { %v834_v7 = vpop.f32.mrf.mxu2 }
 0x4ff   : > { %v846_v16 = vadd.f32 %v834_v7, %v2084_v11 }
 0x501   : > { %v855_v25 = vsel %vm443_vm1, %v846_v16, 0.0 }
 0x502   : > { %856 = vadd.xlane.f32.xlu2 %v855_v25 }
 0x506   : > { %v837_v26 = vpop.f32.mrf.mxu3 }
 0x507   : > { %v847_v27 = vadd.f32 %v837_v26, %v2094_v15  ;;  %v863_v15 = vsub.f32 1.0, %v862_v36 }
 0x508   : > { %v828_v28 = vpop.f32.mrf.mxu0 }
 0x509   : > { %v844_v29 = vadd.f32 %v828_v28, %v2081_v10  ;;  %v858_v30 = vsel %vm443_vm1, %v847_v27, 0.0  ;;  %v864_v37 = vmul.f32 %v1784_v35, %v863_v15 }
 0x50a   : > { %859 = vadd.xlane.f32.xlu2 %v858_v30 }
 0x50b   : > { %v849_v31 = vsel %vm443_vm1, %v844_v29, 0.0  ;;  %v865_v38 = vadd.f32 %v1784_v35, %v864_v37 }
 0x50c   : > { %850 = vadd.xlane.f32.xlu1 %v849_v31 }
 0x50d   : > { %v2170_v10 = vsel %vm866_vm0, %v1784_v35, %v865_v38  ;;  %v1779_v35 = vld [vmem:[%s2518_s6] ss:$0 sm:$0xff] }
 0x50e   : > { %v1780_v38 = vld [vmem:[%s2519_s7] ss:$0 sm:$0xff] }
 0x510   : > { %v831_v32 = vpop.f32.mrf.mxu1 }
 0x511   : > { %v845_v33 = vadd.f32 %v831_v32, %v2091_v14 }
 0x513   : > { %v852_v11 = vsel %vm443_vm1, %v845_v33, 0.0 }
 0x514   : > { %853 = vadd.xlane.f32.xlu1 %v852_v11 }
 0x575   : > { %v857_v39 = vpop.xlane.xlu2 %856 }
 0x576   : > { %v870_v40 = vmul.f32 %v2170_v10, %v857_v39 }
 0x578   : > { %v2173_v41 = vsub.f32 %v846_v16, %v870_v40 }
 0x57a   : > { %v878_v14 = vmul.f32 %v2173_v41, %v2173_v41 }
 0x57c   : > { %v886_v42 = vsel %vm443_vm1, %v878_v14, 0.0 }
 0x57d   : > { %887 = vadd.xlane.f32.xlu0 %v886_v42  ;;  %v860_v43 = vpop.xlane.xlu2 %859 }
 0x57e   : > { %v871_v47 = vmul.f32 %v2170_v10, %v860_v43 }
 0x57f   : > { %v851_v45 = vpop.xlane.xlu1 %850 }
 0x580   : > { %v868_v46 = vmul.f32 %v2170_v10, %v851_v45  ;;  %v2180_v49 = vsub.f32 %v847_v27, %v871_v47 }
 0x582   : > { %v872_v48 = vsub.f32 %v844_v29, %v868_v46  ;;  %v879_v55 = vmul.f32 %v2180_v49, %v2180_v49 }
 0x584   : > { %v876_v44 = vmul.f32 %v872_v48, %v872_v48  ;;  %v889_v58 = vsel %vm443_vm1, %v879_v55, 0.0 }
 0x586   : > { %v880_v50 = vsel %vm443_vm1, %v876_v44, 0.0 }
 0x587   : > { %881 = vadd.xlane.f32.xlu1 %v880_v50  ;;  %v854_v51 = vpop.xlane.xlu1 %853 }
 0x588   : > { %v869_v52 = vmul.f32 %v2170_v10, %v854_v51 }
 0x58a   : > { %v2184_v53 = vsub.f32 %v845_v33, %v869_v52 }
 0x58c   : > { %v877_v56 = vmul.f32 %v2184_v53, %v2184_v53 }
 0x58e   : > { %v883_v59 = vsel %vm443_vm1, %v877_v56, 0.0 }
 0x58f   : > { %890 = vadd.xlane.f32.xlu1 %v889_v58  ;;  %884 = vadd.xlane.f32.xlu2 %v883_v59 }
 0x5f0   : > { %v888_v60 = vpop.xlane.xlu0 %887 }
 0x5f1   : > { %v894_v61 = vmul.f32 %v888_v60, %v2170_v10 }
 0x5f3   : > { %v898_v62 = vadd.f32 1e-05, %v894_v61 }
 0x5f5   : > { %1785 = vrsqrt.f32 %v898_v62  ;;  %vm926_vm10 = vweird.f32 %v898_v62 }
 0x5fa   : > { %v882_v63 = vpop.xlane.xlu1 %881 }
 0x5fb   : > { %v1786_v0 = vpop.eup %1785  ;;  %v892_v1 = vmul.f32 %v882_v63, %v2170_v10 }
 0x5fc   : > { %v921_v2 = vmul.f32 %v1786_v0, %v898_v62  ;;  %vm927_vm8 = vweird.f32 %v1786_v0 }
 0x5fd   : > { %v896_v3 = vadd.f32 1e-05, %v892_v1  ;;  %vm2196_vm11 = vmor %vm926_vm10, %vm927_vm8 }
 0x5fe   : > { %v922_v4 = vmul.f32 %v1786_v0, %v921_v2 }
 0x5ff   : > { %1787 = vrsqrt.f32 %v896_v3  ;;  %vm906_vm12 = vweird.f32 %v896_v3 }
 0x600   : > { %v923_v57 = vmul.f32 0.5, %v922_v4 }
 0x602   : > { %v885_v5 = vpop.xlane.xlu2 %884  ;;  %v891_v6 = vpop.xlane.xlu1 %890  ;;  %v924_v22 = vsub.f32 1.5, %v923_v57 }
 0x603   : > { %v893_v54 = vmul.f32 %v885_v5, %v2170_v10  ;;  %v895_v18 = vmul.f32 %v891_v6, %v2170_v10 }
 0x604   : > { %v925_v7 = vmul.f32 %v1786_v0, %v924_v22 }
 0x605   : > { %v1788_v19 = vpop.eup %1787  ;;  %v897_v20 = vadd.f32 1e-05, %v893_v54  ;;  %v899_v17 = vadd.f32 1e-05, %v895_v18 }
 0x606   : > { %v901_v21 = vmul.f32 %v1788_v19, %v896_v3  ;;  %vm907_vm9 = vweird.f32 %v1788_v19  ;;  %v929_v33 = vsel %vm2196_vm11, %v1786_v0, %v925_v7 }
 0x607   : > { %1789 = vrsqrt.f32 %v897_v20  ;;  %vm908_vm13 = vmor %vm906_vm12, %vm907_vm9  ;;  %v942_v39 = vmul.f32 %v929_v33, %v2173_v41  ;;  %vm916_vm2 = vweird.f32 %v897_v20  ;;  %vm936_vm4 = vweird.f32 %v899_v17 }
 0x608   : > { %v902_v23 = vmul.f32 %v1788_v19, %v901_v21  ;;  %1791 = vrsqrt.f32 %v899_v17 }
 0x609   : > { %v949_v47 = vmul.f32 %v1779_v35, %v942_v39 }
 0x60a   : > { %v903_v24 = vmul.f32 0.5, %v902_v23 }
 0x60b   : > { %v956_v51 = vadd.f32 %v1780_v38, %v949_v47 }
 0x60c   : > { %v904_v16 = vsub.f32 1.5, %v903_v24 }
 0x60d   : > { %v1790_v25 = vpop.eup %1789  ;;  %v964_v58 = vsel %vm443_vm1, %v956_v51, 0.0 }
 0x60e   : > { %v1792_v26 = vpop.eup %1791  ;;  %v905_v28 = vmul.f32 %v1788_v19, %v904_v16  ;;  %v911_v29 = vmul.f32 %v1790_v25, %v897_v20  ;;  %vm917_vm14 = vweird.f32 %v1790_v25 }
 0x60f   : > { %v931_v30 = vmul.f32 %v1792_v26, %v899_v17  ;;  %vm937_vm15 = vweird.f32 %v1792_v26  ;;  %vm918_vm3 = vmor %vm916_vm2, %vm917_vm14 }
 0x610   : > { %v912_v31 = vmul.f32 %v1790_v25, %v911_v29  ;;  %v909_v32 = vsel %vm908_vm13, %v1788_v19, %v905_v28  ;;  %vm938_vm5 = vmor %vm936_vm4, %vm937_vm15 }
 0x611   : > { %v932_v11 = vmul.f32 %v1792_v26, %v931_v30  ;;  %v940_v34 = vmul.f32 %v909_v32, %v872_v48 }
 0x612   : > { %v913_v36 = vmul.f32 0.5, %v912_v31 }
 0x613   : > { %v933_v15 = vmul.f32 0.5, %v932_v11  ;;  %v947_v37 = vmul.f32 %v1779_v35, %v940_v34 }
 0x614   : > { %v914_v40 = vsub.f32 1.5, %v913_v36 }
 0x615   : > { %v934_v14 = vsub.f32 1.5, %v933_v15  ;;  %v954_v42 = vadd.f32 %v1780_v38, %v947_v37 }
 0x616   : > { %v915_v43 = vmul.f32 %v1790_v25, %v914_v40 }
 0x617   : > { %v935_v45 = vmul.f32 %v1792_v26, %v934_v14  ;;  %v958_v46 = vsel %vm443_vm1, %v954_v42, 0.0  ;;  %v2242_v14 = vld [vmem:[%s2520_s8] ss:$0 sm:$0xff] }
 0x618   : > { %959 = vadd.xlane.f32.xlu2 %v958_v46  ;;  %v919_v48 = vsel %vm918_vm3, %v1790_v25, %v915_v43  ;;  %v2247_v46 = vld [vmem:[%s2521_s9] ss:$0 sm:$0xff] }
 0x619   : > { %v941_v44 = vmul.f32 %v919_v48, %v2184_v53  ;;  %v939_v50 = vsel %vm938_vm5, %v1792_v26, %v935_v45 }
 0x61a   : > { %v943_v52 = vmul.f32 %v939_v50, %v2180_v49 }
 0x61b   : > { %v948_v41 = vmul.f32 %v1779_v35, %v941_v44 }
 0x61c   : > { %v950_v59 = vmul.f32 %v1779_v35, %v943_v52 }
 0x61d   : > { %v955_v55 = vadd.f32 %v1780_v38, %v948_v41 }
 0x61e   : > { %v957_v60 = vadd.f32 %v1780_v38, %v950_v59 }
 0x61f   : > { %v961_v56 = vsel %vm443_vm1, %v955_v55, 0.0 }
 0x620   : > { %962 = vadd.xlane.f32.xlu1 %v961_v56  ;;  %965 = vadd.xlane.f32.xlu2 %v964_v58  ;;  %v967_v61 = vsel %vm443_vm1, %v957_v60, 0.0 }
 0x628   : > { %968 = vadd.xlane.f32.xlu1 %v967_v61 }
 0x68b   : > { %v960_v62 = vpop.xlane.xlu2 %959 }
 0x68c   : > { %v970_v53 = vmul.f32 %v960_v62, %v2170_v10 }
 0x68e   : > { %v974_v63 = vsub.f32 %v954_v42, %v970_v53 }
 0x690   : > { %v978_v0 = vmul.f32 %v974_v63, %v974_v63 }
 0x692   : > { %v982_v1 = vsel %vm443_vm1, %v978_v0, 0.0 }
 0x693   : > { %983 = vadd.xlane.f32.xlu2 %v982_v1  ;;  %v966_v49 = vpop.xlane.xlu2 %965  ;;  %v963_v2 = vpop.xlane.xlu1 %962 }
 0x694   : > { %v972_v3 = vmul.f32 %v966_v49, %v2170_v10  ;;  %v971_v4 = vmul.f32 %v963_v2, %v2170_v10 }
 0x696   : > { %v2219_v5 = vsub.f32 %v956_v51, %v972_v3  ;;  %v2221_v6 = vsub.f32 %v955_v55, %v971_v4 }
 0x698   : > { %v980_v54 = vmul.f32 %v2219_v5, %v2219_v5  ;;  %v979_v18 = vmul.f32 %v2221_v6, %v2221_v6 }
 0x69a   : > { %v988_v57 = vsel %vm443_vm1, %v980_v54, 0.0  ;;  %v985_v19 = vsel %vm443_vm1, %v979_v18, 0.0 }
 0x69b   : > { %989 = vadd.xlane.f32.xlu2 %v988_v57  ;;  %986 = vadd.xlane.f32.xlu1 %v985_v19  ;;  %v969_v20 = vpop.xlane.xlu1 %968 }
 0x69c   : > { %v973_v17 = vmul.f32 %v969_v20, %v2170_v10  ;;  %v2268_v20 = vmov 0.0  }
 0x69e   : > { %v2230_v21 = vsub.f32 %v957_v60, %v973_v17  ;;  %v2270_v17 = vmov 0.0  }
 0x6a0   : > { %v981_v22 = vmul.f32 %v2230_v21, %v2230_v21 }
 0x6a2   : > { %v991_v23 = vsel %vm443_vm1, %v981_v22, 0.0  ;;  %v2272_v22 = vmov 0.0  }
 0x6a3   : > { %992 = vadd.xlane.f32.xlu1 %v991_v23  ;;  %v2274_v23 = vmov 0.0  }
 0x706   : > { %v984_v24 = vpop.xlane.xlu2 %983 }
 0x707   : > { %v994_v7 = vmul.f32 %v984_v24, %v2170_v10 }
 0x709   : > { %v998_v16 = vadd.f32 1e-05, %v994_v7 }
 0x70b   : > { %1793 = vrsqrt.f32 %v998_v16  ;;  %vm1008_vm7 = vweird.f32 %v998_v16 }
 0x70e   : > { %v990_v25 = vpop.xlane.xlu2 %989  ;;  %v987_v26 = vpop.xlane.xlu1 %986 }
 0x70f   : > { %v996_v27 = vmul.f32 %v990_v25, %v2170_v10  ;;  %v995_v28 = vmul.f32 %v987_v26, %v2170_v10 }
 0x711   : > { %v1794_v29 = vpop.eup %1793  ;;  %v1000_v30 = vadd.f32 1e-05, %v996_v27  ;;  %v999_v31 = vadd.f32 1e-05, %v995_v28 }
 0x712   : > { %v1003_v32 = vmul.f32 %v1794_v29, %v998_v16  ;;  %vm1009_vm6 = vweird.f32 %v1794_v29 }
 0x713   : > { %1795 = vrsqrt.f32 %v1000_v30  ;;  %vm1010_vm0 = vmor %vm1008_vm7, %vm1009_vm6  ;;  %vm1028_vm10 = vweird.f32 %v1000_v30  ;;  %vm1018_vm12 = vweird.f32 %v999_v31 }
 0x714   : > { %v1004_v33 = vmul.f32 %v1794_v29, %v1003_v32  ;;  %1797 = vrsqrt.f32 %v999_v31 }
 0x716   : > { %v1005_v11 = vmul.f32 0.5, %v1004_v33  ;;  %v993_v34 = vpop.xlane.xlu1 %992 }
 0x717   : > { %v997_v35 = vmul.f32 %v993_v34, %v2170_v10 }
 0x718   : > { %v1006_v36 = vsub.f32 1.5, %v1005_v11 }
 0x719   : > { %v1796_v15 = vpop.eup %1795  ;;  %v1001_v37 = vadd.f32 1e-05, %v997_v35 }
 0x71a   : > { %v1798_v38 = vpop.eup %1797  ;;  %v1007_v39 = vmul.f32 %v1794_v29, %v1006_v36  ;;  %v1023_v40 = vmul.f32 %v1796_v15, %v1000_v30  ;;  %vm1029_vm8 = vweird.f32 %v1796_v15 }
 0x71b   : > { %v1013_v42 = vmul.f32 %v1798_v38, %v999_v31  ;;  %1799 = vrsqrt.f32 %v1001_v37  ;;  %vm1019_vm9 = vweird.f32 %v1798_v38  ;;  %vm1030_vm11 = vmor %vm1028_vm10, %vm1029_vm8  ;;  %vm1038_vm15 = vweird.f32 %v1001_v37 }
 0x71c   : > { %v1011_v43 = vsel %vm1010_vm0, %v1794_v29, %v1007_v39  ;;  %v1024_v45 = vmul.f32 %v1796_v15, %v1023_v40  ;;  %vm1020_vm13 = vmor %vm1018_vm12, %vm1019_vm9 }
 0x71d   : > { %v1042_v47 = vmul.f32 %v1011_v43, %v974_v63  ;;  %v1014_v48 = vmul.f32 %v1798_v38, %v1013_v42 }
 0x71e   : > { %v1025_v44 = vmul.f32 0.5, %v1024_v45 }
 0x71f   : > { %v1049_v50 = vmul.f32 %v2242_v14, %v1042_v47  ;;  %v1015_v41 = vmul.f32 0.5, %v1014_v48 }
 0x720   : > { %v1026_v51 = vsub.f32 1.5, %v1025_v44 }
 0x721   : > { %v1800_v52 = vpop.eup %1799  ;;  %v2251_v55 = vadd.f32 %v2247_v46, %v1049_v50  ;;  %v1016_v56 = vsub.f32 1.5, %v1015_v41 }
 0x722   : > { %v1027_v58 = vmul.f32 %v1796_v15, %v1026_v51  ;;  %v1033_v59 = vmul.f32 %v1800_v52, %v1001_v37  ;;  %vm1039_vm14 = vweird.f32 %v1800_v52 }
 0x723   : > { %v1017_v60 = vmul.f32 %v1798_v38, %v1016_v56  ;;  %vm1040_vm2 = vmor %vm1038_vm15, %vm1039_vm14 }
 0x724   : > { %v1031_v61 = vsel %vm1030_vm11, %v1796_v15, %v1027_v58  ;;  %v1034_v62 = vmul.f32 %v1800_v52, %v1033_v59 }
 0x725   : > { %v1044_v53 = vmul.f32 %v1031_v61, %v2219_v5  ;;  %v1021_v63 = vsel %vm1020_vm13, %v1798_v38, %v1017_v60 }
 0x726   : > { %v1043_v0 = vmul.f32 %v1021_v63, %v2221_v6  ;;  %v1035_v1 = vmul.f32 0.5, %v1034_v62 }
 0x727   : > { %v1051_v49 = vmul.f32 %v2242_v14, %v1044_v53 }
 0x728   : > { %v1050_v2 = vmul.f32 %v2242_v14, %v1043_v0  ;;  %v1036_v3 = vsub.f32 1.5, %v1035_v1 }
 0x729   : > { %v2258_v4 = vadd.f32 %v2247_v46, %v1051_v49 }
 0x72a   : > { %v2261_v54 = vadd.f32 %v2247_v46, %v1050_v2  ;;  %v1037_v18 = vmul.f32 %v1800_v52, %v1036_v3 }
 0x72c   : > { %v1041_v5 = vsel %vm1040_vm2, %v1800_v52, %v1037_v18 }
 0x72d   : > { %v1045_v57 = vmul.f32 %v1041_v5, %v2230_v21 }
 0x72f   : > { %v1052_v6 = vmul.f32 %v2242_v14, %v1045_v57 }
 0x731   : > { %v2266_v19 = vadd.f32 %v2247_v46, %v1052_v6 }
 0x732 LB: >> { %s1603_s21 = sshll.u32 %s1943_s20, 5  ;;  %s1612_s30 = sshll.u32 %s1943_s20, 6  ;;  %vm1303_vm9 = vcmask 523264   ;;  %s1943_s20 = sphi %s2276_s20, %s1065_s20   ;;  %v1939_v23 = vphi %v2274_v23, %v2532_v23   ;;  %v1935_v22 = vphi %v2272_v22, %v2531_v22   ;;  %v1931_v17 = vphi %v2270_v17, %v2530_v17   ;;  %v1927_v20 = vphi %v2268_v20, %v2529_v20  }
 0x733   : >> { %s1071_s29 = scalar_lea.vmem %s2516_s4, %s1603_s21  ;;  %s2322_s18 = scalar_lea.vmem %s2517_s5, %s1612_s30 }
 0x734   : >> { %v1075_v21 = vld [vmem:[%s1071_s29 + $0x18] sm:$0xff]  ;;  %v1074_v24 = vld [vmem:[%s1071_s29 + $0x10] sm:$0xff]  ;;  %v1073_v7 = vld [vmem:[%s1071_s29 + $0x8] sm:$0xff]  ;;  %s1065_s20 = sadd.s32 1, %s1943_s20  }
 0x735   : >> { %1100 = vmatpush.msra.mxu0 %v1075_v21  ;;  %1637 = vmatpush.msra.mxu3 %v1075_v21  ;;  %v1072_v16 = vld [vmem:[%s1071_s29] sm:$0xff]  ;;  %v1302_v15 = vld [vmem:[%s2322_s18 + $0x38] sm:$0xff]  ;;  %v1301_v40 = vld [vmem:[%s2322_s18 + $0x30] sm:$0xff]  ;;  %p1062_p12 = scmp.ge.s32.totalorder %s1065_s20, 2  }
 0x736   : >> { %1324 = vmatpush.msra.mxu1 %v1302_v15  ;;  %1641 = vmatpush.msra.mxu2 %v1302_v15  ;;  %v1300_v50 = vld [vmem:[%s2322_s18 + $0x28] sm:$0xff]  ;;  %v1299_v58 = vld [vmem:[%s2322_s18 + $0x20] sm:$0xff]  ;;  %v1298_v63 = vld [vmem:[%s2322_s18 + $0x18] sm:$0xff]  ;;  %s1625_s20 = sshll.u32 (%p1062_p12), %s2028_s17, 5  ;;  %s1471_s27 = sshll.u32 (%p1062_p12), %s2097_s25, 4  ;;  %s1472_s27 = int_to_ptr.vmem [resolvable:$true] %s1471_s27 }
 0x737   : >> { %1101 = vmatpush.msra.mxu0 %v1074_v24  ;;  %1638 = vmatpush.msra.mxu3 %v1074_v24  ;;  %v1297_v57 = vld [vmem:[%s2322_s18 + $0x10] sm:$0xff]  ;;  %s1470_s17 = scalar_lea.hbm (%p1062_p12), %s2522_s10, %s1625_s20  ;;  %s1458_s30 = scalar_lea.sflag (%p1062_p12), [#allocation3], %s353_s26 }
 0x738   : >> { %1325 = vmatpush.msra.mxu1 %v1301_v40  ;;  %1642 = vmatpush.msra.mxu2 %v1301_v40  ;;  %s1473_s29 = sshll.u32 (%p1062_p12), %s1470_s17, 4  ;;  %s1837_s21 = scalar_lea.hbm (%p1062_p12), %s2522_s10, 64  ;;  %s1474_s29 = int_to_ptr.hbm [resolvable:$true] %s1473_s29 }
 0x739   : >> { %1102 = vmatpush.msra.mxu0 %v1073_v7  ;;  %1639 = vmatpush.msra.mxu3 %v1073_v7  ;;  %s1831_s11 = sshra.s32 (%p1062_p12), %s1474_s29, 4  ;;  %s1832_s11 = int_to_ptr.hbm [resolvable:$true] %s1831_s11 }
 0x73a   : >> { %1326 = vmatpush.msra.mxu1 %v1300_v50  ;;  %1643 = vmatpush.msra.mxu2 %v1300_v50  ;;  %s1833_s12 = scalar_lea.hbm (%p1062_p12), %s1832_s11, 32  ;;  %p1838_p2 = scmp.lt.s32.totalorder (%p1062_p12), %s1832_s11, %s2522_s10 }
 0x73b   : >> { %1103 = vmatpush.msra.mxu0 %v1072_v16  ;;  %1640 = vmatpush.msra.mxu3 %v1072_v16  ;;  %v1296_v16 = vld [vmem:[%s2322_s18 + $0x8] sm:$0xff]  ;;  %p1834_p13 = scmp.ne.s32.totalorder (%p1062_p12), %s1832_s11, %s1833_s12  ;;  %p1839_p3 = scmp.lt.s32.totalorder (%p1062_p12), %s1837_s21, %s1833_s12 }
 0x73c   : >> { %1604 = vmatmul.msk.f32.vlgmr.msra.gmra.mxu0 %vm443_vm1, %v2251_v55  ;;  %1605 = vmatmul.msk.f32.vlgmr.msra.gmra.mxu3 %vm443_vm1, %v2261_v54 }
 0x73d   : >> { %1327 = vmatpush.msra.mxu1 %v1299_v58  ;;  %1644 = vmatpush.msra.mxu2 %v1299_v58  ;;  %p1835_p0 = pnand (%p1062_p12), %p1834_p13, %p2045_p5  ;;  %p1840_p4 = por (%p1062_p12), %p1839_p3, %p1838_p2 }
 0x73f   : >> { %1328 = vmatpush.msra.mxu1 %v1298_v63  ;;  %1645 = vmatpush.msra.mxu2 %v1298_v63  ;;  %p1836_p1 = pneg (%p1062_p12), %p1835_p0 }
 0x741   : >> { %1329 = vmatpush.msra.mxu1 %v1297_v57  ;;  %1646 = vmatpush.msra.mxu2 %v1297_v57  ;;  %p1841_p7 = pnand (%p1062_p12), %p1840_p4, %p1836_p1 }
 0x743   : >> { %1330 = vmatpush.msra.mxu1 %v1296_v16  ;;  %1647 = vmatpush.msra.mxu2 %v1296_v16 }
 0x744   : >> { %1606 = vmatmul.msk.f32.gmra.mxu3 %vm443_vm1, %v2258_v4 }
 0x74c   : >> { %1607 = vmatmul.msk.f32.gmra.mxu3 %vm443_vm1, %v2266_v19 }
 0x7b9   : >> { %v2305_v25 = vpop.f32.mrf.mxu0 }
 0x7ba   : >> { %v2308_v26 = vmul.f32 0.70710677, %v2305_v25 }
 0x7bc   : >> { %v1125_v27 = vmul.f32 %v2308_v26, %v2308_v26 }
 0x7be   : >> { %v2313_v28 = vmin.f32 %v1125_v27, 16.0 }
 0x7bf   : >> { %v2315_v29 = vpop.f32.mrf.mxu3 }
 0x7c0   : >> { %v1127_v30 = vmul.f32 2.1237322e-06, %v2313_v28  ;;  %v1138_v31 = vmul.f32 3.8918573e-05, %v2313_v28  ;;  %v2325_v32 = vmul.f32 0.70710677, %v2315_v29 }
 0x7c2   : >> { %v1128_v33 = vadd.f32 0.00028619796, %v1127_v30  ;;  %v1139_v11 = vadd.f32 0.001143296, %v1138_v31  ;;  %v1165_v34 = vmul.f32 %v2325_v32, %v2325_v32 }
 0x7c4   : >> { %v1129_v35 = vmul.f32 %v1128_v33, %v2313_v28  ;;  %v1140_v36 = vmul.f32 %v1139_v11, %v2313_v28  ;;  %v2332_v37 = vmin.f32 %v1165_v34, 16.0  ;;  %v1295_v34 = vld [vmem:[%s2322_s18] sm:$0xff] }
 0x7c5   : >> { %1331 = vmatpush.msra.mxu1 %v1295_v34  ;;  %1648 = vmatpush.msra.mxu2 %v1295_v34 }
 0x7c6   : >> { %v1130_v38 = vadd.f32 0.0036580483, %v1129_v35  ;;  %v1141_v39 = vadd.f32 0.014752088, %v1140_v36  ;;  %v1167_v42 = vmul.f32 2.1237322e-06, %v2332_v37 }
 0x7c7   : >> { %v1178_v43 = vmul.f32 3.8918573e-05, %v2332_v37  ;;  %v2337_v45 = vpop.f32.mrf.mxu3 }
 0x7c8   : >> { %v1131_v47 = vmul.f32 %v1130_v38, %v2313_v28  ;;  %v1142_v48 = vmul.f32 %v1141_v39, %v2313_v28  ;;  %v2342_v44 = vmul.f32 0.70710677, %v2337_v45  ;;  %v1168_v41 = vadd.f32 0.00028619796, %v1167_v42 }
 0x7c9   : >> { %v1179_v51 = vadd.f32 0.001143296, %v1178_v43 }
 0x7ca   : >> { %v1143_v52 = vadd.f32 0.112945676, %v1142_v48  ;;  %v1205_v56 = vmul.f32 %v2342_v44, %v2342_v44  ;;  %v1169_v59 = vmul.f32 %v1168_v41, %v2332_v37  ;;  %v1132_v61 = vadd.f32 0.05243302, %v1131_v47 }
 0x7cb   : >> { %v1180_v60 = vmul.f32 %v1179_v51, %v2332_v37 }
 0x7cc   : >> { %v1144_v62 = vmul.f32 %v1143_v52, %v2313_v28  ;;  %v2351_v53 = vmin.f32 %v1205_v56, 16.0  ;;  %v1170_v0 = vadd.f32 0.0036580483, %v1169_v59  ;;  %v1133_v6 = vmul.f32 %v1132_v61, %v2313_v28 }
 0x7cd   : >> { %v1181_v1 = vadd.f32 0.014752088, %v1180_v60 }
 0x7ce   : >> { %v1145_v49 = vadd.f32 0.4994258, %v1144_v62  ;;  %v1207_v2 = vmul.f32 2.1237322e-06, %v2351_v53  ;;  %v1218_v18 = vmul.f32 3.8918573e-05, %v2351_v53  ;;  %v1171_v24 = vmul.f32 %v1170_v0, %v2332_v37 }
 0x7cf   : >> { %v1182_v3 = vmul.f32 %v1181_v1, %v2332_v37  ;;  %v2357_v5 = vpop.f32.mrf.mxu3  ;;  %v1134_v15 = vadd.f32 0.18741608, %v1133_v6 }
 0x7d0   : >> { %v1146_v21 = vmul.f32 %v1145_v49, %v2313_v28  ;;  %v1208_v7 = vadd.f32 0.00028619796, %v1207_v2  ;;  %v1219_v30 = vadd.f32 0.001143296, %v1218_v18  ;;  %v2366_v11 = vmul.f32 0.70710677, %v2357_v5 }
 0x7d1   : >> { %v1183_v27 = vadd.f32 0.112945676, %v1182_v3  ;;  %v1172_v38 = vadd.f32 0.05243302, %v1171_v24  ;;  %v1135_v50 = vmul.f32 %v1134_v15, %v2313_v28 }
 0x7d2   : >> { %v1147_v31 = vadd.f32 1.0, %v1146_v21  ;;  %v1209_v33 = vmul.f32 %v1208_v7, %v2351_v53  ;;  %v1220_v36 = vmul.f32 %v1219_v30, %v2351_v53  ;;  %v1245_v40 = vmul.f32 %v2366_v11, %v2366_v11 }
 0x7d3   : >> { %v1184_v35 = vmul.f32 %v1183_v27, %v2332_v37  ;;  %v1173_v41 = vmul.f32 %v1172_v38, %v2332_v37  ;;  %v1136_v63 = vadd.f32 1.1283791, %v1135_v50 }
 0x7d4   : >> { %1801 = vrcp.f32 %v1147_v31  ;;  %v1210_v42 = vadd.f32 0.0036580483, %v1209_v33  ;;  %v1221_v43 = vadd.f32 0.014752088, %v1220_v36  ;;  %v2374_v48 = vmin.f32 %v1245_v40, 16.0 }
 0x7d5   : >> { %v1185_v39 = vadd.f32 0.4994258, %v1184_v35  ;;  %v1174_v0 = vadd.f32 0.18741608, %v1173_v41  ;;  %v1157_v3 = vand.u32 2147483647, %v1147_v31  ;;  %v1137_v16 = vmul.f32 %v1136_v63, %v2308_v26 }
 0x7d6   : >> { %v1222_v51 = vmul.f32 %v1221_v43, %v2351_v53  ;;  %v1247_v56 = vmul.f32 2.1237322e-06, %v2374_v48  ;;  %v1211_v59 = vmul.f32 %v1210_v42, %v2351_v53  ;;  %v1258_v61 = vmul.f32 3.8918573e-05, %v2374_v48 }
 0x7d7   : >> { %v1186_v47 = vmul.f32 %v1185_v39, %v2332_v37  ;;  %v1159_v18 = vand.u32 2147483648, %v1147_v31  ;;  %vm1153_vm4 = vweird.f32 %v1147_v31  ;;  %v1175_v33 = vmul.f32 %v1174_v0, %v2332_v37 }
 0x7d8   : >> { %v1223_v60 = vadd.f32 0.112945676, %v1222_v51  ;;  %v1248_v49 = vadd.f32 0.00028619796, %v1247_v56  ;;  %v1259_v2 = vadd.f32 0.001143296, %v1258_v61 }
 0x7d9   : >> { %v1187_v52 = vadd.f32 1.0, %v1186_v47  ;;  %v1212_v57 = vadd.f32 0.05243302, %v1211_v59  ;;  %vm1158_vm6 = vcmp.eq.f32.partialorder %v1157_v3, 8.507059e+37  ;;  %v1160_v36 = vor.u32 1.1754944e-38, %v1159_v18 }
 0x7da   : >> { %v1802_v58 = vpop.eup %1801  ;;  %v1224_v28 = vmul.f32 %v1223_v60, %v2351_v53  ;;  %v1249_v24 = vmul.f32 %v1248_v49, %v2374_v48  ;;  %v1260_v7 = vmul.f32 %v1259_v2, %v2374_v48  ;;  %v1176_v50 = vadd.f32 1.1283791, %v1175_v33 }
 0x7db   : >> { %v1149_v62 = vmul.f32 %v1802_v58, %v1147_v31  ;;  %1803 = vrcp.f32 %v1187_v52  ;;  %vm1154_vm3 = vweird.f32 %v1802_v58  ;;  %v1213_v38 = vmul.f32 %v1212_v57, %v2351_v53 }
 0x7dc   : >> { %v1225_v21 = vadd.f32 0.4994258, %v1224_v28  ;;  %v1261_v35 = vadd.f32 0.014752088, %v1260_v7  ;;  %vm1155_vm5 = vmor %vm1153_vm4, %vm1154_vm3  ;;  %v1250_v42 = vadd.f32 0.0036580483, %v1249_v24  ;;  %vm1193_vm0 = vweird.f32 %v1187_v52 }
 0x7dd   : >> { %v1150_v1 = vsub.f32 1.0, %v1149_v62  ;;  %v1199_v37 = vand.u32 2147483648, %v1187_v52  ;;  %v1197_v51 = vand.u32 2147483647, %v1187_v52  ;;  %v1214_v60 = vadd.f32 0.18741608, %v1213_v38 }
 0x7de   : >> { %v1226_v34 = vmul.f32 %v1225_v21, %v2351_v53  ;;  %v1262_v26 = vmul.f32 %v1261_v35, %v2374_v48  ;;  %v1251_v61 = vmul.f32 %v1250_v42, %v2374_v48  ;;  %v1117_v63 = vmul.f32 0.5, %v2305_v25 }
 0x7df   : >> { %v1151_v6 = vmul.f32 %v1802_v58, %v1150_v1  ;;  %v1200_v1 = vor.u32 1.1754944e-38, %v1199_v37  ;;  %v1177_v28 = vmul.f32 %v1176_v50, %v2325_v32  ;;  %vm1198_vm10 = vcmp.eq.f32.partialorder %v1197_v51, 8.507059e+37 }
 0x7e0   : >> { %v1227_v40 = vadd.f32 1.0, %v1226_v34  ;;  %v1263_v56 = vadd.f32 0.112945676, %v1262_v26  ;;  %v1252_v21 = vadd.f32 0.05243302, %v1251_v61  ;;  %v1119_v51 = vmul.f32 0.5, %v2337_v45 }
 0x7e1   : >> { %v1804_v27 = vpop.eup %1803  ;;  %v1152_v30 = vadd.f32 %v1802_v58, %v1151_v6  ;;  %v1215_v6 = vmul.f32 %v1214_v60, %v2351_v53  ;;  %v1118_v53 = vmul.f32 0.5, %v2315_v29 }
 0x7e2   : >> { %v1189_v15 = vmul.f32 %v1804_v27, %v1187_v52  ;;  %1805 = vrcp.f32 %v1227_v40  ;;  %vm1194_vm7 = vweird.f32 %v1804_v27  ;;  %v1239_v33 = vand.u32 2147483648, %v1227_v40 }
 0x7e3   : >> { %v1156_v39 = vsel %vm1155_vm5, %v1802_v58, %v1152_v30  ;;  %v1264_v58 = vmul.f32 %v1263_v56, %v2374_v48  ;;  %vm1195_vm8 = vmor %vm1193_vm0, %vm1194_vm7  ;;  %v1216_v30 = vadd.f32 1.1283791, %v1215_v6  ;;  %v1253_v32 = vmul.f32 %v1252_v21, %v2374_v48 }
 0x7e4   : >> { %v1161_v31 = vsel %vm1158_vm6, %v1160_v36, %v1156_v39  ;;  %v1190_v43 = vsub.f32 1.0, %v1189_v15  ;;  %v1237_v36 = vand.u32 2147483647, %v1227_v40  ;;  %vm1233_vm12 = vweird.f32 %v1227_v40 }
 0x7e5   : >> { %v1162_v47 = vmul.f32 %v1161_v31, %v1137_v16  ;;  %v1265_v2 = vadd.f32 0.4994258, %v1264_v58  ;;  %v1240_v39 = vor.u32 1.1754944e-38, %v1239_v33  ;;  %v1254_v42 = vadd.f32 0.18741608, %v1253_v32 }
 0x7e6   : >> { %v1191_v41 = vmul.f32 %v1804_v27, %v1190_v43  ;;  %v1217_v26 = vmul.f32 %v1216_v30, %v2342_v44  ;;  %vm1238_vm14 = vcmp.eq.f32.partialorder %v1237_v36, 8.507059e+37 }
 0x7e7   : >> { %v1608_v59 = vclamps-f32 %v1162_v47, 1.0  ;;  %v1266_v7 = vmul.f32 %v1265_v2, %v2374_v48  ;;  %v1255_v37 = vmul.f32 %v1254_v42, %v2374_v48 }
 0x7e8   : >> { %v1192_v62 = vadd.f32 %v1804_v27, %v1191_v41  ;;  %v1806_v3 = vpop.eup %1805 }
 0x7e9   : >> { %v1285_v0 = vadd.f32 1.0, %v1608_v59  ;;  %v1229_v24 = vmul.f32 %v1806_v3, %v1227_v40  ;;  %vm1234_vm11 = vweird.f32 %v1806_v3  ;;  %v1256_v59 = vadd.f32 1.1283791, %v1255_v37 }
 0x7ea   : >> { %v1196_v49 = vsel %vm1195_vm8, %v1804_v27, %v1192_v62  ;;  %v1267_v27 = vadd.f32 1.0, %v1266_v7  ;;  %vm1235_vm13 = vmor %vm1233_vm12, %vm1234_vm11 }
 0x7eb   : >> { %v1289_v18 = vmul.f32 %v1285_v0, %v1117_v63  ;;  %v1201_v57 = vsel %vm1198_vm10, %v1200_v1, %v1196_v49  ;;  %v1230_v16 = vsub.f32 1.0, %v1229_v24  ;;  %v1257_v48 = vmul.f32 %v1256_v59, %v2366_v11 }
 0x7ec   : >> { %v1202_v52 = vmul.f32 %v1201_v57, %v1177_v28  ;;  %1807 = vrcp.f32 %v1267_v27  ;;  %v1279_v60 = vand.u32 2147483648, %v1267_v27  ;;  %v1277_v44 = vand.u32 2147483647, %v1267_v27 }
 0x7ed   : >> { %1613 = vmatmul.msk.f32.vlgmr.msra.gmra.mxu1 %vm1303_vm9, %v1289_v18  ;;  %v1231_v35 = vmul.f32 %v1806_v3, %v1230_v16  ;;  %vm1273_vm2 = vweird.f32 %v1267_v27  ;;  %v1120_v49 = vmul.f32 0.5, %v2357_v5 }
 0x7ee   : >> { %v1609_v25 = vclamps-f32 %v1202_v52, 1.0  ;;  %v1280_v63 = vor.u32 1.1754944e-38, %v1279_v60  ;;  %vm1278_vm4 = vcmp.eq.f32.partialorder %v1277_v44, 8.507059e+37 }
 0x7ef   : >> { %v1232_v15 = vadd.f32 %v1806_v3, %v1231_v35 }
 0x7f0   : >> { %v1286_v34 = vadd.f32 1.0, %v1609_v25 }
 0x7f1   : >> { %v1236_v31 = vsel %vm1235_vm13, %v1806_v3, %v1232_v15 }
 0x7f2   : >> { %v1290_v38 = vmul.f32 %v1286_v34, %v1118_v53  ;;  %v1241_v43 = vsel %vm1238_vm14, %v1240_v39, %v1236_v31  ;;  %v1808_v50 = vpop.eup %1807 }
 0x7f3   : >> { %v1242_v47 = vmul.f32 %v1241_v43, %v1217_v26  ;;  %v1269_v29 = vmul.f32 %v1808_v50, %v1267_v27  ;;  %vm1274_vm15 = vweird.f32 %v1808_v50 }
 0x7f4   : >> { %vm1275_vm3 = vmor %vm1273_vm2, %vm1274_vm15 }
 0x7f5   : >> { %1614 = vmatmul.msk.f32.gmra.mxu1 %vm1303_vm9, %v1290_v38  ;;  %v1610_v41 = vclamps-f32 %v1242_v47, 1.0  ;;  %v1270_v56 = vsub.f32 1.0, %v1269_v29 }
 0x7f7   : >> { %v1287_v40 = vadd.f32 1.0, %v1610_v41  ;;  %v1271_v62 = vmul.f32 %v1808_v50, %v1270_v56 }
 0x7f9   : >> { %v1291_v61 = vmul.f32 %v1287_v40, %v1119_v51  ;;  %v1272_v58 = vadd.f32 %v1808_v50, %v1271_v62 }
 0x7fb   : >> { %1615 = vmatmul.msk.f32.vlgmr.msra.gmra.mxu2 %vm1303_vm9, %v1291_v61  ;;  %v1276_v0 = vsel %vm1275_vm3, %v1808_v50, %v1272_v58 }
 0x7fc   : >> { %v1281_v1 = vsel %vm1278_vm4, %v1280_v63, %v1276_v0 }
 0x7fd   : >> { %v1282_v45 = vmul.f32 %v1281_v1, %v1257_v48 }
 0x7ff   : >> { %v1611_v28 = vclamps-f32 %v1282_v45, 1.0 }
 0x801   : >> { %v1288_v2 = vadd.f32 1.0, %v1611_v28 }
 0x803   : >> { %v1292_v3 = vmul.f32 %v1288_v2, %v1120_v49 }
 0x805   : >> { %1616 = vmatmul.msk.f32.gmra.mxu2 %vm1303_vm9, %v1292_v3 }
 0x86a   : >> { %v1333_v18 = vpop.f32.mrf.mxu1 }
 0x86b   : >> { %v1345_v57 = vadd.f32 %v1939_v23, %v1333_v18  }
 0x86d   : >> { %v2532_v23 = vmov %v1345_v57  ;;  %v1349_v5 = vadd.f32 (%p1062_p12), %v1345_v57, %v2251_v55 }
 0x86f   : > { %v1353_v16 = vsel (%p1062_p12), %vm443_vm1, %v1349_v5, 0.0 }
 0x870   : > { %1354 = vadd.xlane.f32.xlu0 (%p1062_p12), %v1353_v16 }
 0x872   : >> { %v1336_v6 = vpop.f32.mrf.mxu1 }
 0x873   : >> { %v1346_v21 = vadd.f32 %v1935_v22, %v1336_v6  }
 0x875   : >> { %v2531_v22 = vmov %v1346_v21  ;;  %v1350_v33 = vadd.f32 (%p1062_p12), %v1346_v21, %v2261_v54 }
 0x877   : > { %v1356_v27 = vsel (%p1062_p12), %vm443_vm1, %v1350_v33, 0.0 }
 0x878   : > { %1357 = vadd.xlane.f32.xlu0 (%p1062_p12), %v1356_v27 }
 0x87e   : >> { %v1339_v52 = vpop.f32.mrf.mxu2 }
 0x87f   : >> { %v1347_v11 = vadd.f32 %v1931_v17, %v1339_v52  }
 0x881   : >> { %v2530_v17 = vmov %v1347_v11  ;;  %v1351_v23 = vadd.f32 (%p1062_p12), %v1347_v11, %v2258_v4 }
 0x883   : > { %v1359_v25 = vsel (%p1062_p12), %vm443_vm1, %v1351_v23, 0.0 }
 0x884   : > { %1360 = vadd.xlane.f32.xlu1 (%p1062_p12), %v1359_v25 }
 0x887   : > { %1064 = sbr.rel (!%p1062_p12) target bundleno = 1842 (0x732), region = 123 }
 0x888   : >> { %v1342_v24 = vpop.f32.mrf.mxu2 }
 0x889   : >> { %v1348_v7 = vadd.f32 %v1927_v20, %v1342_v24  }
 0x88b   : >> { %v2529_v20 = vmov %v1348_v7  ;;  %v1352_v30 = vadd.f32 (%p1062_p12), %v1348_v7, %v2266_v19 }
 0x88d   : > { %v1362_v32 = vsel %vm443_vm1, %v1352_v30, 0.0 }
 0x88e   : > { %1363 = vadd.xlane.f32.xlu1 %v1362_v32 }
 0x8e3   : > { %v1355_v4 = vpop.xlane.xlu0 %1354 }
 0x8e4   : > { %v1365_v17 = vmul.f32 %v1355_v4, %v2170_v10 }
 0x8e6   : > { %v1369_v34 = vsub.f32 %v1349_v5, %v1365_v17 }
 0x8e8   : > { %v1373_v35 = vmul.f32 %v1369_v34, %v1369_v34 }
 0x8ea   : > { %v1377_v36 = vsel %vm443_vm1, %v1373_v35, 0.0 }
 0x8eb   : > { %1378 = vadd.xlane.f32.xlu2 %v1377_v36  ;;  %v1358_v15 = vpop.xlane.xlu0 %1357 }
 0x8ec   : > { %v1366_v39 = vmul.f32 %v1358_v15, %v2170_v10 }
 0x8ee   : > { %v2443_v26 = vsub.f32 %v1350_v33, %v1366_v39 }
 0x8f0   : > { %v1374_v43 = vmul.f32 %v2443_v26, %v2443_v26 }
 0x8f2   : > { %v1380_v50 = vsel %vm443_vm1, %v1374_v43, 0.0 }
 0x8f3   : > { %1381 = vadd.xlane.f32.xlu2 %v1380_v50 }
 0x8f7   : > { %v1361_v20 = vpop.xlane.xlu1 %1360 }
 0x8f8   : > { %v1367_v55 = vmul.f32 %v1361_v20, %v2170_v10 }
 0x8fa   : > { %v2433_v22 = vsub.f32 %v1351_v23, %v1367_v55 }
 0x8fc   : > { %v1375_v19 = vmul.f32 %v2433_v22, %v2433_v22 }
 0x8fe   : > { %v1383_v54 = vsel %vm443_vm1, %v1375_v19, 0.0 }
 0x8ff   : > { %1384 = vadd.xlane.f32.xlu0 %v1383_v54 }
 0x901   : > { %v1364_v53 = vpop.xlane.xlu1 %1363 }
 0x902   : > { %v1368_v38 = vmul.f32 %v1364_v53, %v2170_v10 }
 0x904   : > { %v2441_v42 = vsub.f32 %v1352_v30, %v1368_v38 }
 0x906   : > { %v1376_v31 = vmul.f32 %v2441_v42, %v2441_v42 }
 0x908   : > { %v1386_v47 = vsel %vm443_vm1, %v1376_v31, 0.0 }
 0x909   : > { %1387 = vadd.xlane.f32.xlu1 %v1386_v47 }
 0x95e   : > { %v1379_v37 = vpop.xlane.xlu2 %1378 }
 0x95f   : > { %v1389_v29 = vmul.f32 %v1379_v37, %v2170_v10 }
 0x961   : > { %v1393_v40 = vadd.f32 1e-05, %v1389_v29 }
 0x963   : > { %1809 = vrsqrt.f32 %v1393_v40  ;;  %vm1403_vm7 = vweird.f32 %v1393_v40 }
 0x966   : > { %v1382_v60 = vpop.xlane.xlu2 %1381 }
 0x967   : > { %v1390_v62 = vmul.f32 %v1382_v60, %v2170_v10 }
 0x969   : > { %v1810_v44 = vpop.eup %1809  ;;  %v1394_v63 = vadd.f32 1e-05, %v1390_v62 }
 0x96a   : > { %v1398_v0 = vmul.f32 %v1810_v44, %v1393_v40  ;;  %vm1404_vm5 = vweird.f32 %v1810_v44 }
 0x96b   : > { %vm1405_vm0 = vmor %vm1403_vm7, %vm1404_vm5  ;;  %vm1413_vm14 = vweird.f32 %v1394_v63 }
 0x96c   : > { %v1399_v45 = vmul.f32 %v1810_v44, %v1398_v0 }
 0x96e   : > { %v1400_v49 = vmul.f32 0.5, %v1399_v45 }
 0x970   : > { %v1401_v3 = vsub.f32 1.5, %v1400_v49 }
 0x972   : > { %v1385_v41 = vpop.xlane.xlu0 %1384  ;;  %v1402_v21 = vmul.f32 %v1810_v44, %v1401_v3 }
 0x973   : > { %v1391_v51 = vmul.f32 %v1385_v41, %v2170_v10 }
 0x974   : > { %v1406_v24 = vsel %vm1405_vm0, %v1810_v44, %v1402_v21 }
 0x975   : > { %v1395_v56 = vadd.f32 1e-05, %v1391_v51  ;;  %v1437_v23 = vmul.f32 %v1406_v24, %v1369_v34 }
 0x977   : > { %1811 = vrsqrt.f32 %v1395_v56  ;;  %vm1423_vm8 = vweird.f32 %v1395_v56  ;;  %v1441_v33 = vmul.f32 %v2242_v14, %v1437_v23 }
 0x979   : > { %v1445_v4 = vadd.f32 %v2247_v46, %v1441_v33 }
 0x97c   : > { %v1388_v59 = vpop.xlane.xlu1 %1387 }
 0x97d   : > { %v1392_v61 = vmul.f32 %v1388_v59, %v2170_v10  ;;  %v1812_v48 = vpop.eup %1811 }
 0x97e   : > { %v1418_v1 = vmul.f32 %v1812_v48, %v1395_v56  ;;  %vm1424_vm6 = vweird.f32 %v1812_v48 }
 0x97f   : > { %v1396_v58 = vadd.f32 1e-05, %v1392_v61  ;;  %vm1425_vm9 = vmor %vm1423_vm8, %vm1424_vm6 }
 0x980   : > { %v1419_v28 = vmul.f32 %v1812_v48, %v1418_v1 }
 0x981   : > { %1813 = vrsqrt.f32 %v1396_v58  ;;  %vm1433_vm12 = vweird.f32 %v1396_v58 }
 0x982   : > { %1815 = vrsqrt.f32 %v1394_v63  ;;  %v1420_v2 = vmul.f32 0.5, %v1419_v28 }
 0x984   : > { %v1421_v57 = vsub.f32 1.5, %v1420_v2 }
 0x986   : > { %v1422_v52 = vmul.f32 %v1812_v48, %v1421_v57 }
 0x987   : > { %v1814_v18 = vpop.eup %1813 }
 0x988   : > { %v1816_v6 = vpop.eup %1815  ;;  %v1428_v10 = vmul.f32 %v1814_v18, %v1396_v58  ;;  %v1426_v5 = vsel %vm1425_vm9, %v1812_v48, %v1422_v52  ;;  %vm1434_vm10 = vweird.f32 %v1814_v18 }
 0x989   : > { %v1408_v11 = vmul.f32 %v1816_v6, %v1394_v63  ;;  %v1439_v16 = vmul.f32 %v1426_v5, %v2433_v22  ;;  %vm1414_vm11 = vweird.f32 %v1816_v6  ;;  %v1449_v22 = vadd.f32 %v1445_v4, %v2076_v8  ;;  %vm1435_vm13 = vmor %vm1433_vm12, %vm1434_vm10 }
 0x98a   : > { %v1429_v7 = vmul.f32 %v1814_v18, %v1428_v10  ;;  %vm1415_vm15 = vmor %vm1413_vm14, %vm1414_vm11 }
 0x98b   : > { %v1409_v25 = vmul.f32 %v1816_v6, %v1408_v11  ;;  %v1443_v27 = vmul.f32 %v2242_v14, %v1439_v16  ;;  %1453 = vst.msk [vmem:[%s2097_s25] sm:$0xff] %vm443_vm1, %v1449_v22 }
 0x98c   : > { %v1430_v30 = vmul.f32 0.5, %v1429_v7 }
 0x98d   : > { %v1410_v32 = vmul.f32 0.5, %v1409_v25  ;;  %v1447_v17 = vadd.f32 %v2247_v46, %v1443_v27 }
 0x98e   : > { %v1431_v20 = vsub.f32 1.5, %v1430_v30 }
 0x98f   : > { %v1411_v55 = vsub.f32 1.5, %v1410_v32  ;;  %v1451_v35 = vadd.f32 %v1447_v17, %v2078_v9 }
 0x990   : > { %v1432_v34 = vmul.f32 %v1814_v18, %v1431_v20 }
 0x991   : > { %v1412_v19 = vmul.f32 %v1816_v6, %v1411_v55  ;;  %1455 = vst.msk [vmem:[%s2097_s25 + $0x10] sm:$0xff] %vm443_vm1, %v1451_v35 }
 0x992   : > { %v1436_v54 = vsel %vm1435_vm13, %v1814_v18, %v1432_v34 }
 0x993   : > { %v1440_v36 = vmul.f32 %v1436_v54, %v2441_v42  ;;  %v1416_v53 = vsel %vm1415_vm15, %v1816_v6, %v1412_v19 }
 0x994   : > { %v1438_v8 = vmul.f32 %v1416_v53, %v2443_v26 }
 0x995   : > { %v1444_v9 = vmul.f32 %v2242_v14, %v1440_v36 }
 0x996   : > { %v1442_v15 = vmul.f32 %v2242_v14, %v1438_v8 }
 0x997   : > { %v1448_v38 = vadd.f32 %v2247_v46, %v1444_v9 }
 0x998   : > { %v1446_v39 = vadd.f32 %v2247_v46, %v1442_v15 }
 0x999   : > { %v1452_v42 = vadd.f32 %v1448_v38, %v2088_v13 }
 0x99a   : > { %v1450_v31 = vadd.f32 %v1446_v39, %v2086_v12 }
 0x99b   : > { %1456 = vst.msk [vmem:[%s2097_s25 + $0x18] sm:$0xff] %vm443_vm1, %v1452_v42 }
 0x99c   : > { %1454 = vst.msk [vmem:[%s2097_s25 + $0x8] sm:$0xff] %vm443_vm1, %v1450_v31 }
 0x99d   : > { %1844 = shalt.err (!%p1841_p7)
}
 0x99e   : > { %s1950_s26 = smov 128   ;;  %s1951_s25 = smov 8  }
 0x99f   : > { %1649 = dma.vmem_to_hbm [thread:$0]  (%p2045_p5), %s1472_s27, 512, %s1474_s29, %s1458_s30, %s1950_s26, %s1950_s26, %s1951_s25  }
 0x9a0 PF: > { %p1655_p8 = scmp.ge.s32.totalorder %s1911_s16, 2  ;;  %s1488_s18 = sand.u32 1, %s1899_s13  }
 0x9a1   : > { %s1489_s20 = scalar_lea.sflag [#allocation3], %s1488_s18 }
 0x9a2   : > { %p1652_p9 = pnand %p1655_p8, %p2049_p6 }
 0x9a4   : > { %p1653_p10 = pneg %p1652_p9 }
 0x9a6   : > { %1894 = dma.done.wait (%p1653_p10), %s1489_s20, 512  }
 0x9a7   : > { %1896 = vsyncadd (%p1653_p10), %s1489_s20, 4294966784  ;;  %p20_p11 = scmp.ge.s32.totalorder %s2032_s19, 4   ;;  %s2533_s13 = smov %s1903_s14 }
 0x9a8   : > { %s2534_s14 = smov %s1907_s15  ;;  %s2535_s15 = smov %s2043_s22 }
 0x9a9   : > { %s2536_s16 = smov %s2032_s19  ;;  %22 = sbr.rel (!%p20_p11) target bundleno = 3 (0x3), region = 134 }
 0x9ae   :  { %1495 = vsyncpa [#allocation3], 1 }
 0x9af   :  { %1497 = vsyncpa [#allocation3 + $0x1], 1 }

</bundles_post_ra>
